<compile_context>
chip_gen: v6e
topology: v6e:2x2x1
jax: 0.10.0
libtpu: 0.0.40
codegen_flags: <defaults>
</compile_context>

<pallas_src>
import functools

import jax
import jax.numpy as jnp
from jax import lax
from jax.experimental import pallas as pl
from jax.experimental.pallas import tpu as pltpu


# Below this trip count the iteration loop is fully unrolled (static Python
# for); above it we use lax.fori_loop to bound vreg pressure / code size.
_UNROLL_MAX_ITER = 8


def _pgextra_kernel(step_ref, lam_ref, w_ref, a_ref, b_ref, out_ref, *,
                    max_iter, use_bf16_matmul):
    """Runs all PG-EXTRA iterations for one batch element.

    Refs (per grid step, one batch element):
      step_ref: (num_layers,) f32 in SMEM
      lam_ref : (num_layers,) f32 in SMEM
      w_ref   : (N, N)        f32 in VMEM   (mixing matrix, shared)
      a_ref   : (1, N, M, D)  f32 in VMEM
      b_ref   : (1, N, M)     f32 in VMEM
      out_ref : (max_iter, 1, N, D) f32 in VMEM
                out_ref[0] = x_1, out_ref[k] = x_2 at step k (k >= 1)
    """
    W = w_ref[...]            # (N, N)
    A = a_ref[0]              # (N, M, D)
    bb = b_ref[0]             # (N, M)
    N, M, D = A.shape

    if use_bf16_matmul:
        # v6e/v7x: bf16 MXU operands, f32 accumulation.
        W_mm = W.astype(jnp.bfloat16)

        def conv(x):          # (N, D) -> (N, D), MXU matmul
            return jnp.dot(W_mm, x.astype(jnp.bfloat16),
                           preferred_element_type=jnp.float32)
    else:
        def conv(x):          # (N, D) -> (N, D), MXU matmul (f32)
            return jnp.dot(W, x, preferred_element_type=jnp.float32)

    # Per-node A / A^T applications (VPU multiply + reduce; temporaries are
    # sub-vreg at these M, D — see header note about the dot_general form).
    def a_apply(x):           # (N, D) -> (N, M):   (A[n] @ x[n]) per node
        return jnp.sum(A * x[:, None, :], axis=-1)

    def at_apply(r):          # (N, M) -> (N, D):   (A[n]^T @ r[n]) per node
        return jnp.sum(A * r[:, :, None], axis=1)

    def act(x, tau):          # soft threshold
        return jnp.maximum(x - tau, 0.0) - jnp.maximum(-x - tau, 0.0)

    # ---- init (k = 0): x0 = 0 => conv(x0) = 0, tgrad(x0) = -A^T b ----------
    ATb = at_apply(bb)                              # (N, D), computed once
    x0 = jnp.zeros((N, D), jnp.float32)
    conv_prev = jnp.zeros((N, D), jnp.float32)      # carries conv(x0)
    x12 = step_ref[0] * ATb                         # = conv(0) - step0*tgrad(0)
    x1 = act(x12, lam_ref[0])
    out_ref[0, 0] = x1

    # ---- iterations k = 1 .. max_iter-1 ------------------------------------
    # One W-matmul and one A/A^T apply pair per iteration:
    #   tgrad(x1) - tgrad(x0) = A^T A (x1 - x0)   (b term cancels)
    #   conv(x0)              = conv_prev         (carried from step k-1)
    def body(k, carry):
        x0_, x1_, x12_, conv_prev_ = carry
        conv1 = conv(x1_)
        gdiff = at_apply(a_apply(x1_ - x0_))
        x32 = (conv1 + x12_
               - (conv_prev_ + x0_) * 0.5
               - step_ref[k] * gdiff)
        x2 = act(x32, lam_ref[k])
        out_ref[k, 0] = x2
        return (x1_, x2, x32, conv1)

    carry = (x0, x1, x12, conv_prev)
    if max_iter <= _UNROLL_MAX_ITER:
        for k in range(1, max_iter):    # static unroll (max_iter is static)
            carry = body(k, carry)
    else:
        lax.fori_loop(1, max_iter, body, carry)


def net_pgextra_forward(W, A, b, step_size, lam, max_iter,
                        use_bf16_matmul=False):
    """Pallas implementation of Net_PGEXTRA.forward.

    Returns (ret_z, x_final, x_hist) matching the PyTorch module:
      ret_z  : (max_iter - 1, B, N, D)
      x_final: (B, N, D)
      x_hist : python list [zeros, x_1, x_2@k=1, ..., x_2@k=max_iter-1]
    """
    B, N, M, D = A.shape
    assert max_iter >= 2, "PyTorch reference requires max_iter >= 2"
    # Guard SMEM scalar reads step_ref[k]/lam_ref[k] (SMEM OOB is unchecked).
    assert step_size.shape[0] >= max_iter and lam.shape[0] >= max_iter

    kernel = functools.partial(_pgextra_kernel, max_iter=max_iter,
                               use_bf16_matmul=use_bf16_matmul)

    # Explicit VMEM budget: W + A block + b block + out block (f32), with
    # headroom for double-buffering and working set; comfortably under the
    # 64 MiB physical VMEM of v7x and the 16 MiB default scoped limit of v5e.
    block_bytes = 4 * (N * N + N * M * D + N * M + max_iter * N * D)
    vmem_limit = int(min(max(6 * block_bytes, 8 << 20), 48 << 20))

    all_x = pl.pallas_call(
        kernel,
        out_shape=jax.ShapeDtypeStruct((max_iter, B, N, D), jnp.float32),
        grid_spec=pltpu.PrefetchScalarGridSpec(
            num_scalar_prefetch=0,
            grid=(B,),   # one batch element per step; B even keeps v7x 2 TCs busy
            in_specs=[
                pl.BlockSpec(memory_space=pltpu.MemorySpace.SMEM),   # step_size
                pl.BlockSpec(memory_space=pltpu.MemorySpace.SMEM),   # lam
                pl.BlockSpec((N, N), lambda i: (0, 0)),              # W (shared)
                pl.BlockSpec((1, N, M, D), lambda i: (i, 0, 0, 0)),  # A[b]
                pl.BlockSpec((1, N, M), lambda i: (i, 0, 0)),        # b[b]
            ],
            out_specs=pl.BlockSpec((max_iter, 1, N, D), lambda i: (0, i, 0, 0)),
        ),
        compiler_params=pltpu.CompilerParams(
            dimension_semantics=("parallel",),
            vmem_limit_bytes=vmem_limit,
        ),
    )(step_size, lam, W, A, b)

    init_x = jnp.zeros((B, N, D), jnp.float32)
    ret_z = all_x[1:]                         # stacked x_2's
    x_final = all_x[-1]
    x_hist = [init_x] + [all_x[k] for k in range(max_iter)]
    return ret_z, x_final, x_hist


def _reference_forward(W, A, b, step_size, lam, max_iter):
    """Pure-JAX reference mirroring the PyTorch forward (original formulas)."""
    B, N, M, D = A.shape

    def conv(x):
        return jnp.einsum("ij,bjd->bid", W, x)

    def tgrad(x):
        Ax = jnp.einsum("bnmd,bnd->bnm", A, x)
        return jnp.einsum("bnmd,bnm->bnd", A, Ax - b)

    def act(x, ii):
        tau = lam[ii]
        return jnp.maximum(x - tau, 0.0) - jnp.maximum(-x - tau, 0.0)

    x0 = jnp.zeros((B, N, D), jnp.float32)
    x12 = conv(x0) - step_size[0] * tgrad(x0)
    x1 = act(x12, 0)
    outs = [x1]
    for k in range(1, max_iter):
        x32 = (conv(x1) + x12 - (conv(x0) + x0) / 2.0
               - step_size[k] * (tgrad(x1) - tgrad(x0)))
        x2 = act(x32, k)
        outs.append(x2)
        x0, x1, x12 = x1, x2, x32
    return jnp.stack(outs)


if __name__ == "__main__":
    key = jax.random.PRNGKey(0)
    kW, kA, kb = jax.random.split(key, 3)

    # Small shapes consistent with the module:
    B, N, M, D = 2, 8, 5, 16        # batch, nodes, rows of A_i, dim  (N*D = 128)
    num_layers = 8
    max_iter = 5
    step_size_val = 0.05

    # Metropolis-style symmetric mixing matrix (deterministic values).
    W_raw = jax.random.uniform(kW, (N, N), jnp.float32)
    W = (W_raw + W_raw.T) / (2.0 * N)
    W = W + jnp.eye(N, dtype=jnp.float32) * (1.0 - jnp.sum(W, axis=1))  # rows sum to 1

    A = jax.random.normal(kA, (B, N, M, D), jnp.float32)
    b = jax.random.normal(kb, (B, N, M), jnp.float32)

    # Deterministic learnable parameters, as in __init__:
    step_size = jnp.ones((num_layers,), jnp.float32) * step_size_val
    lam = jnp.ones((num_layers,), jnp.float32) * step_size_val * 10.0

    ret_z, x_final, x_hist = net_pgextra_forward(W, A, b, step_size, lam, max_iter)
    ret_z = jax.block_until_ready(ret_z)
    x_final = jax.block_until_ready(x_final)

    # Check against pure-JAX reference (original, un-optimized formulas).
    all_x_ref = _reference_forward(W, A, b, step_size, lam, max_iter)
    ref_ret_z = all_x_ref[1:]
    ref_x_final = all_x_ref[-1]
    assert ret_z.shape == (max_iter - 1, B, N, D)
    assert x_final.shape == (B, N, D)
    assert len(x_hist) == max_iter + 1
    assert jnp.allclose(ret_z, ref_ret_z, atol=1e-5, rtol=1e-5)
    assert jnp.allclose(x_final, ref_x_final, atol=1e-5, rtol=1e-5)

    print("KERNEL_OK")
</pallas_src>

<mosaic_0001>
module attributes {stable_mosaic.version = 11 : i64} {
  func.func @_pgextra_kernel(%arg0: i32, %arg1: memref<8xf32, #tpu.memory_space<smem>>, %arg2: memref<8xf32, #tpu.memory_space<smem>>, %arg3: memref<8x8xf32, #tpu.memory_space<vmem>>, %arg4: memref<1x8x5x16xf32, #tpu.memory_space<vmem>>, %arg5: memref<1x8x5xf32, #tpu.memory_space<vmem>>, %arg6: memref<5x1x8x16xf32, #tpu.memory_space<vmem>>) attributes {dimension_semantics = [#tpu.dimension_semantics<parallel>], iteration_bounds = array<i64: 2>, scalar_prefetch = 0 : i64, scratch_operands = 0 : i64, tpu.core_type = #tpu.core_type<tc>, window_params = [{transform_indices = @transform_0, window_bounds = array<i64: 8>}, {transform_indices = @transform_1, window_bounds = array<i64: 8>}, {pipeline_mode = #tpu.pipeline_mode<synchronous>, transform_indices = @transform_2, window_bounds = array<i64: 8, 8>}, {transform_indices = @transform_3, window_bounds = array<i64: 1, 8, 5, 16>}, {transform_indices = @transform_4, window_bounds = array<i64: 1, 8, 5>}, {transform_indices = @transform_5, window_bounds = array<i64: 5, 1, 8, 16>}]} {
    %c0 = arith.constant 0 : index
    %c0_0 = arith.constant 0 : index
    %0 = vector.load %arg3[%c0, %c0_0] : memref<8x8xf32, #tpu.memory_space<vmem>>, vector<8x8xf32>
    %c0_1 = arith.constant 0 : index
    %c0_2 = arith.constant 0 : index
    %c0_3 = arith.constant 0 : index
    %c0_4 = arith.constant 0 : index
    %1 = vector.load %arg4[%c0_1, %c0_2, %c0_3, %c0_4] : memref<1x8x5x16xf32, #tpu.memory_space<vmem>>, vector<1x8x5x16xf32>
    %2 = vector.shape_cast %1 : vector<1x8x5x16xf32> to vector<8x5x16xf32>
    %c0_5 = arith.constant 0 : index
    %c0_6 = arith.constant 0 : index
    %c0_7 = arith.constant 0 : index
    %3 = vector.load %arg5[%c0_5, %c0_6, %c0_7] : memref<1x8x5xf32, #tpu.memory_space<vmem>>, vector<1x8x5xf32>
    %4 = vector.shape_cast %3 : vector<1x8x5xf32> to vector<8x5xf32>
    %5 = vector.shape_cast %4 : vector<8x5xf32> to vector<8x5x1xf32>
    %6 = vector.broadcast %5 : vector<8x5x1xf32> to vector<8x5x16xf32>
    %7 = arith.mulf %2, %6 : vector<8x5x16xf32>
    %cst = arith.constant dense<0.000000e+00> : vector<8x16xf32>
    %8 = vector.multi_reduction <add>, %7, %cst [1] : vector<8x5x16xf32> to vector<8x16xf32>
    %cst_8 = arith.constant 0.000000e+00 : f32
    %9 = vector.broadcast %cst_8 : f32 to vector<8x16xf32>
    %cst_9 = arith.constant 0.000000e+00 : f32
    %10 = vector.broadcast %cst_9 : f32 to vector<8x16xf32>
    %c0_10 = arith.constant 0 : index
    %11 = memref.load %arg1[%c0_10] : memref<8xf32, #tpu.memory_space<smem>>
    %12 = vector.broadcast %11 : f32 to vector<8x16xf32>
    %13 = arith.mulf %12, %8 : vector<8x16xf32>
    %c0_11 = arith.constant 0 : index
    %14 = memref.load %arg2[%c0_11] : memref<8xf32, #tpu.memory_space<smem>>
    %15 = vector.broadcast %14 : f32 to vector<8x16xf32>
    %16 = arith.subf %13, %15 : vector<8x16xf32>
    %cst_12 = arith.constant 0.000000e+00 : f32
    %17 = vector.broadcast %cst_12 : f32 to vector<8x16xf32>
    %18 = arith.maximumf %16, %17 : vector<8x16xf32>
    %cst_13 = arith.constant 0.000000e+00 : f32
    %19 = vector.broadcast %cst_13 : f32 to vector<8x16xf32>
    %20 = arith.subf %19, %13 : vector<8x16xf32>
    %21 = vector.broadcast %14 : f32 to vector<8x16xf32>
    %22 = arith.subf %20, %21 : vector<8x16xf32>
    %cst_14 = arith.constant 0.000000e+00 : f32
    %23 = vector.broadcast %cst_14 : f32 to vector<8x16xf32>
    %24 = arith.maximumf %22, %23 : vector<8x16xf32>
    %25 = arith.subf %18, %24 : vector<8x16xf32>
    %c0_15 = arith.constant 0 : index
    %c0_16 = arith.constant 0 : index
    %c0_17 = arith.constant 0 : index
    %c0_18 = arith.constant 0 : index
    %26 = vector.load %arg6[%c0_15, %c0_16, %c0_17, %c0_18] : memref<5x1x8x16xf32, #tpu.memory_space<vmem>>, vector<1x1x8x16xf32>
    %27 = vector.shape_cast %26 : vector<1x1x8x16xf32> to vector<8x16xf32>
    %28 = vector.shape_cast %25 : vector<8x16xf32> to vector<1x1x8x16xf32>
    tpu.vector_store %arg6[%c0_15, %c0_16, %c0_17, %c0_18], %28 {strides = array<i32>} : memref<5x1x8x16xf32, #tpu.memory_space<vmem>>, vector<1x1x8x16xf32>,
    %cst_19 = arith.constant dense<0.000000e+00> : vector<8x16xf32>
    %29 = tpu.matmul %0, %25, %cst_19 {dimension_numbers = #tpu.dot_dimension_numbers<[1], [0], [0], [1], [0, 0, 1, 1], [], []>} : vector<8x8xf32>, vector<8x16xf32>, vector<8x16xf32> -> vector<8x16xf32>
    %30 = arith.subf %25, %9 : vector<8x16xf32>
    %31 = vector.shape_cast %30 : vector<8x16xf32> to vector<8x1x16xf32>
    %32 = vector.broadcast %31 : vector<8x1x16xf32> to vector<8x5x16xf32>
    %33 = arith.mulf %2, %32 : vector<8x5x16xf32>
    %cst_20 = arith.constant dense<0.000000e+00> : vector<8x5xf32>
    %34 = vector.multi_reduction <add>, %33, %cst_20 [2] : vector<8x5x16xf32> to vector<8x5xf32>
    %35 = vector.shape_cast %34 : vector<8x5xf32> to vector<8x5x1xf32>
    %36 = vector.broadcast %35 : vector<8x5x1xf32> to vector<8x5x16xf32>
    %37 = arith.mulf %2, %36 : vector<8x5x16xf32>
    %cst_21 = arith.constant dense<0.000000e+00> : vector<8x16xf32>
    %38 = vector.multi_reduction <add>, %37, %cst_21 [1] : vector<8x5x16xf32> to vector<8x16xf32>
    %39 = arith.addf %29, %13 : vector<8x16xf32>
    %40 = arith.addf %10, %9 : vector<8x16xf32>
    %cst_22 = arith.constant 5.000000e-01 : f32
    %41 = vector.broadcast %cst_22 : f32 to vector<8x16xf32>
    %42 = arith.mulf %40, %41 : vector<8x16xf32>
    %43 = arith.subf %39, %42 : vector<8x16xf32>
    %c1 = arith.constant 1 : index
    %44 = memref.load %arg1[%c1] : memref<8xf32, #tpu.memory_space<smem>>
    %45 = vector.broadcast %44 : f32 to vector<8x16xf32>
    %46 = arith.mulf %45, %38 : vector<8x16xf32>
    %47 = arith.subf %43, %46 : vector<8x16xf32>
    %c1_23 = arith.constant 1 : index
    %48 = memref.load %arg2[%c1_23] : memref<8xf32, #tpu.memory_space<smem>>
    %49 = vector.broadcast %48 : f32 to vector<8x16xf32>
    %50 = arith.subf %47, %49 : vector<8x16xf32>
    %cst_24 = arith.constant 0.000000e+00 : f32
    %51 = vector.broadcast %cst_24 : f32 to vector<8x16xf32>
    %52 = arith.maximumf %50, %51 : vector<8x16xf32>
    %cst_25 = arith.constant 0.000000e+00 : f32
    %53 = vector.broadcast %cst_25 : f32 to vector<8x16xf32>
    %54 = arith.subf %53, %47 : vector<8x16xf32>
    %55 = vector.broadcast %48 : f32 to vector<8x16xf32>
    %56 = arith.subf %54, %55 : vector<8x16xf32>
    %cst_26 = arith.constant 0.000000e+00 : f32
    %57 = vector.broadcast %cst_26 : f32 to vector<8x16xf32>
    %58 = arith.maximumf %56, %57 : vector<8x16xf32>
    %59 = arith.subf %52, %58 : vector<8x16xf32>
    %c1_27 = arith.constant 1 : index
    %c0_28 = arith.constant 0 : index
    %c0_29 = arith.constant 0 : index
    %c0_30 = arith.constant 0 : index
    %60 = vector.load %arg6[%c1_27, %c0_28, %c0_29, %c0_30] : memref<5x1x8x16xf32, #tpu.memory_space<vmem>>, vector<1x1x8x16xf32>
    %61 = vector.shape_cast %60 : vector<1x1x8x16xf32> to vector<8x16xf32>
    %62 = vector.shape_cast %59 : vector<8x16xf32> to vector<1x1x8x16xf32>
    tpu.vector_store %arg6[%c1_27, %c0_28, %c0_29, %c0_30], %62 {strides = array<i32>} : memref<5x1x8x16xf32, #tpu.memory_space<vmem>>, vector<1x1x8x16xf32>,
    %cst_31 = arith.constant dense<0.000000e+00> : vector<8x16xf32>
    %63 = tpu.matmul %0, %59, %cst_31 {dimension_numbers = #tpu.dot_dimension_numbers<[1], [0], [0], [1], [0, 0, 1, 1], [], []>} : vector<8x8xf32>, vector<8x16xf32>, vector<8x16xf32> -> vector<8x16xf32>
    %64 = arith.subf %59, %25 : vector<8x16xf32>
    %65 = vector.shape_cast %64 : vector<8x16xf32> to vector<8x1x16xf32>
    %66 = vector.broadcast %65 : vector<8x1x16xf32> to vector<8x5x16xf32>
    %67 = arith.mulf %2, %66 : vector<8x5x16xf32>
    %cst_32 = arith.constant dense<0.000000e+00> : vector<8x5xf32>
    %68 = vector.multi_reduction <add>, %67, %cst_32 [2] : vector<8x5x16xf32> to vector<8x5xf32>
    %69 = vector.shape_cast %68 : vector<8x5xf32> to vector<8x5x1xf32>
    %70 = vector.broadcast %69 : vector<8x5x1xf32> to vector<8x5x16xf32>
    %71 = arith.mulf %2, %70 : vector<8x5x16xf32>
    %cst_33 = arith.constant dense<0.000000e+00> : vector<8x16xf32>
    %72 = vector.multi_reduction <add>, %71, %cst_33 [1] : vector<8x5x16xf32> to vector<8x16xf32>
    %73 = arith.addf %63, %47 : vector<8x16xf32>
    %74 = arith.addf %29, %25 : vector<8x16xf32>
    %cst_34 = arith.constant 5.000000e-01 : f32
    %75 = vector.broadcast %cst_34 : f32 to vector<8x16xf32>
    %76 = arith.mulf %74, %75 : vector<8x16xf32>
    %77 = arith.subf %73, %76 : vector<8x16xf32>
    %c2 = arith.constant 2 : index
    %78 = memref.load %arg1[%c2] : memref<8xf32, #tpu.memory_space<smem>>
    %79 = vector.broadcast %78 : f32 to vector<8x16xf32>
    %80 = arith.mulf %79, %72 : vector<8x16xf32>
    %81 = arith.subf %77, %80 : vector<8x16xf32>
    %c2_35 = arith.constant 2 : index
    %82 = memref.load %arg2[%c2_35] : memref<8xf32, #tpu.memory_space<smem>>
    %83 = vector.broadcast %82 : f32 to vector<8x16xf32>
    %84 = arith.subf %81, %83 : vector<8x16xf32>
    %cst_36 = arith.constant 0.000000e+00 : f32
    %85 = vector.broadcast %cst_36 : f32 to vector<8x16xf32>
    %86 = arith.maximumf %84, %85 : vector<8x16xf32>
    %cst_37 = arith.constant 0.000000e+00 : f32
    %87 = vector.broadcast %cst_37 : f32 to vector<8x16xf32>
    %88 = arith.subf %87, %81 : vector<8x16xf32>
    %89 = vector.broadcast %82 : f32 to vector<8x16xf32>
    %90 = arith.subf %88, %89 : vector<8x16xf32>
    %cst_38 = arith.constant 0.000000e+00 : f32
    %91 = vector.broadcast %cst_38 : f32 to vector<8x16xf32>
    %92 = arith.maximumf %90, %91 : vector<8x16xf32>
    %93 = arith.subf %86, %92 : vector<8x16xf32>
    %c2_39 = arith.constant 2 : index
    %c0_40 = arith.constant 0 : index
    %c0_41 = arith.constant 0 : index
    %c0_42 = arith.constant 0 : index
    %94 = vector.load %arg6[%c2_39, %c0_40, %c0_41, %c0_42] : memref<5x1x8x16xf32, #tpu.memory_space<vmem>>, vector<1x1x8x16xf32>
    %95 = vector.shape_cast %94 : vector<1x1x8x16xf32> to vector<8x16xf32>
    %96 = vector.shape_cast %93 : vector<8x16xf32> to vector<1x1x8x16xf32>
    tpu.vector_store %arg6[%c2_39, %c0_40, %c0_41, %c0_42], %96 {strides = array<i32>} : memref<5x1x8x16xf32, #tpu.memory_space<vmem>>, vector<1x1x8x16xf32>,
    %cst_43 = arith.constant dense<0.000000e+00> : vector<8x16xf32>
    %97 = tpu.matmul %0, %93, %cst_43 {dimension_numbers = #tpu.dot_dimension_numbers<[1], [0], [0], [1], [0, 0, 1, 1], [], []>} : vector<8x8xf32>, vector<8x16xf32>, vector<8x16xf32> -> vector<8x16xf32>
    %98 = arith.subf %93, %59 : vector<8x16xf32>
    %99 = vector.shape_cast %98 : vector<8x16xf32> to vector<8x1x16xf32>
    %100 = vector.broadcast %99 : vector<8x1x16xf32> to vector<8x5x16xf32>
    %101 = arith.mulf %2, %100 : vector<8x5x16xf32>
    %cst_44 = arith.constant dense<0.000000e+00> : vector<8x5xf32>
    %102 = vector.multi_reduction <add>, %101, %cst_44 [2] : vector<8x5x16xf32> to vector<8x5xf32>
    %103 = vector.shape_cast %102 : vector<8x5xf32> to vector<8x5x1xf32>
    %104 = vector.broadcast %103 : vector<8x5x1xf32> to vector<8x5x16xf32>
    %105 = arith.mulf %2, %104 : vector<8x5x16xf32>
    %cst_45 = arith.constant dense<0.000000e+00> : vector<8x16xf32>
    %106 = vector.multi_reduction <add>, %105, %cst_45 [1] : vector<8x5x16xf32> to vector<8x16xf32>
    %107 = arith.addf %97, %81 : vector<8x16xf32>
    %108 = arith.addf %63, %59 : vector<8x16xf32>
    %cst_46 = arith.constant 5.000000e-01 : f32
    %109 = vector.broadcast %cst_46 : f32 to vector<8x16xf32>
    %110 = arith.mulf %108, %109 : vector<8x16xf32>
    %111 = arith.subf %107, %110 : vector<8x16xf32>
    %c3 = arith.constant 3 : index
    %112 = memref.load %arg1[%c3] : memref<8xf32, #tpu.memory_space<smem>>
    %113 = vector.broadcast %112 : f32 to vector<8x16xf32>
    %114 = arith.mulf %113, %106 : vector<8x16xf32>
    %115 = arith.subf %111, %114 : vector<8x16xf32>
    %c3_47 = arith.constant 3 : index
    %116 = memref.load %arg2[%c3_47] : memref<8xf32, #tpu.memory_space<smem>>
    %117 = vector.broadcast %116 : f32 to vector<8x16xf32>
    %118 = arith.subf %115, %117 : vector<8x16xf32>
    %cst_48 = arith.constant 0.000000e+00 : f32
    %119 = vector.broadcast %cst_48 : f32 to vector<8x16xf32>
    %120 = arith.maximumf %118, %119 : vector<8x16xf32>
    %cst_49 = arith.constant 0.000000e+00 : f32
    %121 = vector.broadcast %cst_49 : f32 to vector<8x16xf32>
    %122 = arith.subf %121, %115 : vector<8x16xf32>
    %123 = vector.broadcast %116 : f32 to vector<8x16xf32>
    %124 = arith.subf %122, %123 : vector<8x16xf32>
    %cst_50 = arith.constant 0.000000e+00 : f32
    %125 = vector.broadcast %cst_50 : f32 to vector<8x16xf32>
    %126 = arith.maximumf %124, %125 : vector<8x16xf32>
    %127 = arith.subf %120, %126 : vector<8x16xf32>
    %c3_51 = arith.constant 3 : index
    %c0_52 = arith.constant 0 : index
    %c0_53 = arith.constant 0 : index
    %c0_54 = arith.constant 0 : index
    %128 = vector.load %arg6[%c3_51, %c0_52, %c0_53, %c0_54] : memref<5x1x8x16xf32, #tpu.memory_space<vmem>>, vector<1x1x8x16xf32>
    %129 = vector.shape_cast %128 : vector<1x1x8x16xf32> to vector<8x16xf32>
    %130 = vector.shape_cast %127 : vector<8x16xf32> to vector<1x1x8x16xf32>
    tpu.vector_store %arg6[%c3_51, %c0_52, %c0_53, %c0_54], %130 {strides = array<i32>} : memref<5x1x8x16xf32, #tpu.memory_space<vmem>>, vector<1x1x8x16xf32>,
    %cst_55 = arith.constant dense<0.000000e+00> : vector<8x16xf32>
    %131 = tpu.matmul %0, %127, %cst_55 {dimension_numbers = #tpu.dot_dimension_numbers<[1], [0], [0], [1], [0, 0, 1, 1], [], []>} : vector<8x8xf32>, vector<8x16xf32>, vector<8x16xf32> -> vector<8x16xf32>
    %132 = arith.subf %127, %93 : vector<8x16xf32>
    %133 = vector.shape_cast %132 : vector<8x16xf32> to vector<8x1x16xf32>
    %134 = vector.broadcast %133 : vector<8x1x16xf32> to vector<8x5x16xf32>
    %135 = arith.mulf %2, %134 : vector<8x5x16xf32>
    %cst_56 = arith.constant dense<0.000000e+00> : vector<8x5xf32>
    %136 = vector.multi_reduction <add>, %135, %cst_56 [2] : vector<8x5x16xf32> to vector<8x5xf32>
    %137 = vector.shape_cast %136 : vector<8x5xf32> to vector<8x5x1xf32>
    %138 = vector.broadcast %137 : vector<8x5x1xf32> to vector<8x5x16xf32>
    %139 = arith.mulf %2, %138 : vector<8x5x16xf32>
    %cst_57 = arith.constant dense<0.000000e+00> : vector<8x16xf32>
    %140 = vector.multi_reduction <add>, %139, %cst_57 [1] : vector<8x5x16xf32> to vector<8x16xf32>
    %141 = arith.addf %131, %115 : vector<8x16xf32>
    %142 = arith.addf %97, %93 : vector<8x16xf32>
    %cst_58 = arith.constant 5.000000e-01 : f32
    %143 = vector.broadcast %cst_58 : f32 to vector<8x16xf32>
    %144 = arith.mulf %142, %143 : vector<8x16xf32>
    %145 = arith.subf %141, %144 : vector<8x16xf32>
    %c4 = arith.constant 4 : index
    %146 = memref.load %arg1[%c4] : memref<8xf32, #tpu.memory_space<smem>>
    %147 = vector.broadcast %146 : f32 to vector<8x16xf32>
    %148 = arith.mulf %147, %140 : vector<8x16xf32>
    %149 = arith.subf %145, %148 : vector<8x16xf32>
    %c4_59 = arith.constant 4 : index
    %150 = memref.load %arg2[%c4_59] : memref<8xf32, #tpu.memory_space<smem>>
    %151 = vector.broadcast %150 : f32 to vector<8x16xf32>
    %152 = arith.subf %149, %151 : vector<8x16xf32>
    %cst_60 = arith.constant 0.000000e+00 : f32
    %153 = vector.broadcast %cst_60 : f32 to vector<8x16xf32>
    %154 = arith.maximumf %152, %153 : vector<8x16xf32>
    %cst_61 = arith.constant 0.000000e+00 : f32
    %155 = vector.broadcast %cst_61 : f32 to vector<8x16xf32>
    %156 = arith.subf %155, %149 : vector<8x16xf32>
    %157 = vector.broadcast %150 : f32 to vector<8x16xf32>
    %158 = arith.subf %156, %157 : vector<8x16xf32>
    %cst_62 = arith.constant 0.000000e+00 : f32
    %159 = vector.broadcast %cst_62 : f32 to vector<8x16xf32>
    %160 = arith.maximumf %158, %159 : vector<8x16xf32>
    %161 = arith.subf %154, %160 : vector<8x16xf32>
    %c4_63 = arith.constant 4 : index
    %c0_64 = arith.constant 0 : index
    %c0_65 = arith.constant 0 : index
    %c0_66 = arith.constant 0 : index
    %162 = vector.load %arg6[%c4_63, %c0_64, %c0_65, %c0_66] : memref<5x1x8x16xf32, #tpu.memory_space<vmem>>, vector<1x1x8x16xf32>
    %163 = vector.shape_cast %162 : vector<1x1x8x16xf32> to vector<8x16xf32>
    %164 = vector.shape_cast %161 : vector<8x16xf32> to vector<1x1x8x16xf32>
    tpu.vector_store %arg6[%c4_63, %c0_64, %c0_65, %c0_66], %164 {strides = array<i32>} : memref<5x1x8x16xf32, #tpu.memory_space<vmem>>, vector<1x1x8x16xf32>,
    return
  }
  func.func @transform_0(%arg0: i32) -> i32 {
    %c0_i32 = arith.constant 0 : i32
    %c0_i32_0 = arith.constant 0 : i32
    return %c0_i32 : i32
  }
  func.func @transform_1(%arg0: i32) -> i32 {
    %c0_i32 = arith.constant 0 : i32
    %c0_i32_0 = arith.constant 0 : i32
    return %c0_i32 : i32
  }
  func.func @transform_2(%arg0: i32) -> (i32, i32) {
    %c0_i32 = arith.constant 0 : i32
    %c0_i32_0 = arith.constant 0 : i32
    %c0_i32_1 = arith.constant 0 : i32
    return %c0_i32, %c0_i32_0 : i32, i32
  }
  func.func @transform_3(%arg0: i32) -> (i32, i32, i32, i32) {
    %c0_i32 = arith.constant 0 : i32
    %c0_i32_0 = arith.constant 0 : i32
    %c0_i32_1 = arith.constant 0 : i32
    %c0_i32_2 = arith.constant 0 : i32
    return %arg0, %c0_i32, %c0_i32_0, %c0_i32_1 : i32, i32, i32, i32
  }
  func.func @transform_4(%arg0: i32) -> (i32, i32, i32) {
    %c0_i32 = arith.constant 0 : i32
    %c0_i32_0 = arith.constant 0 : i32
    %c0_i32_1 = arith.constant 0 : i32
    return %arg0, %c0_i32, %c0_i32_0 : i32, i32, i32
  }
  func.func @transform_5(%arg0: i32) -> (i32, i32, i32, i32) {
    %c0_i32 = arith.constant 0 : i32
    %c0_i32_0 = arith.constant 0 : i32
    %c0_i32_1 = arith.constant 0 : i32
    %c0_i32_2 = arith.constant 0 : i32
    return %c0_i32, %arg0, %c0_i32_0, %c0_i32_1 : i32, i32, i32, i32
  }
}

</mosaic_0001>

<bundles_post_ra>
// kernel: tpu_custom_call.1
= control target key start
LH: loop header
LB: loop body
LE: loop exit
PB: predicated region body
PF: predicated region fallthrough
CT: control target
= control target key end

     0   :  { %10 = vsyncpa [#allocation4], 0  ;;  %s2548_s0 = inlined_call_operand.vmem [shape: f32[8], index: 0, kind: input, shape index: {}]   ;;  %s2549_s1 = inlined_call_operand.vmem [shape: f32[8], index: 1, kind: input, shape index: {}]   ;;  %s2550_s2 = inlined_call_operand.vmem [shape: f32[8,8], index: 2, kind: input, shape index: {}]   ;;  %s2551_s3 = inlined_call_operand.vmem [shape: f32[2,8,5,16], index: 3, kind: input, shape index: {}]   ;;  %s2552_s4 = inlined_call_operand.vmem [shape: f32[2,8,5], index: 4, kind: input, shape index: {}]   ;;  %s2553_s5 = inlined_call_operand.hbm [shape: f32[5,2,8,16], index: 5, kind: output, shape index: {}]  }
   0x1   :  { %11 = vsyncpa [#allocation6], 0 }
   0x2   :  { %12 = vsyncpa [#allocation3], 0 }
   0x3   :  { %14 = vsyncpa [#allocation3 + $0x1], 0  ;;  %s1982_s18 = smov 0   ;;  %s1984_s19 = smov 0  }
   0x4   :  { %s1986_s20 = smov 0   ;;  %s1988_s21 = smov 0  }
   0x5 LB: > { %s2003_s22 = sadd.s32 4294967295, %s1941_s21   ;;  %s1709_s23 = sadd.s32 4294967294, %s1941_s21   ;;  %s1941_s21 = sphi %s1988_s21, %s2571_s21   ;;  %s1937_s20 = sphi %s1986_s20, %s2570_s20   ;;  %s1933_s19 = sphi %s1984_s19, %s2569_s19   ;;  %s1929_s18 = sphi %s1982_s18, %s2568_s18  }
   0x6   : > { %s2007_s24 = sadd.s32 1, %s1941_s21   ;;  %s142_s25 = sadd.s32 1, %s1937_s20 }
   0x7   : > { %s139_s26 = ssub.s32 %s1941_s21, %s2007_s24  ;;  %p152_p0 = scmp.ne.s32.totalorder %s1937_s20, %s1933_s19 }
   0x8   : > { %p140_p1 = scmp.eq.s32.totalorder %s139_s26, 0  ;;  %p153_p2 = scmp.eq.s32.totalorder %s2003_s22, 1 }
   0x9   : > { %p158_p3 = scmp.ne.s32.totalorder %s1933_s19, %s1929_s18  ;;  %p159_p4 = scmp.eq.s32.totalorder %s1709_s23, 1 }
   0xa   : > { %s2018_s27 = scalar_select %p140_p1, %s1937_s20, %s142_s25  }
   0xb   : > { %p2020_p5 = por %p153_p2, %p152_p0  ;;  %p2024_p6 = por %p159_p4, %p158_p3 }
   0xc   : > { %p1710_p7 = scmp.ge.s32.totalorder %s1941_s21, 1  ;;  %p166_p8 = scmp.lt.s32.totalorder %s1941_s21, 3 }
   0xd   : > { %s2557_s28 = scalar_select %p2020_p5, 1, 0 }
   0xe   : > { %s2558_s29 = scalar_select %p2024_p6, 1, 0 }
   0xf   : > { %p2554_p9 = scmp.eq.s32.totalorder %s2003_s22, 0  ;;  %p2031_p10 = pnand %p1710_p7, %p166_p8 }
  0x10   : > { %s179_s8 = sshll.u32 %s2548_s0, 4  ;;  %s190_s11 = sshll.u32 %s2549_s1, 4  ;;  %s180_s8 = int_to_ptr.vmem [resolvable:$true] %s179_s8  ;;  %s191_s11 = int_to_ptr.vmem [resolvable:$true] %s190_s11 }
  0x11   : > { %s2559_s30 = scalar_select %p2031_p10, 1, 0 }
  0x12   : > { %p1779_p11 = pneg %p2031_p10  ;;  %s1843_s13 = scalar_lea.vmem %s180_s8, 16 }
  0x13   : > { %p1844_p13 = scmp.ne.s32.totalorder %s180_s8, %s1843_s13  ;;  %p1851_p3 = scmp.lt.s32.totalorder %s180_s8, %s180_s8 }
  0x14   : > { %p2045_p12 = pnand %p2554_p9, %p1779_p11  ;;  %p1852_p4 = scmp.lt.s32.totalorder %s1843_s13, %s1843_s13 }
  0x16   : > { %p1845_p0 = pneg %p2045_p12  ;;  %p1853_p7 = por %p1852_p4, %p1851_p3 }
  0x18   : > { %p1846_p1 = pnand %p1845_p0, %p1844_p13 }
  0x1a   : > { %p1847_p2 = pneg %p1846_p1 }
  0x1c   : > { %p1854_p8 = pnand %p1853_p7, %p1847_p2 }
  0x1e   : > { %1857 = shalt.err (!%p1854_p8)
}
  0x1f   : > { %s1943_s14 = smov [#allocation2]   ;;  %s1858_s15 = scalar_lea.vmem %s191_s11, 16 }
  0x20   : > { %1782 = dma.vmem_to_smem (!%p2045_p12), %s180_s8, 16, %s1943_s14, [#allocation4]  }
  0x21   : > { %p1859_p11 = scmp.ne.s32.totalorder %s191_s11, %s1858_s15  ;;  %p1866_p5 = scmp.lt.s32.totalorder %s191_s11, %s191_s11 }
  0x22   : > { %p1867_p10 = scmp.lt.s32.totalorder %s1858_s15, %s1858_s15 }
  0x23   : > { %p1861_p9 = pnand %p1859_p11, %p1845_p0 }
  0x24   : > { %p1868_p13 = por %p1867_p10, %p1866_p5 }
  0x25   : > { %p1862_p6 = pneg %p1861_p9 }
  0x27   : > { %p1869_p1 = pnand %p1868_p13, %p1862_p6 }
  0x29   : > { %1872 = shalt.err (!%p1869_p1)
}
  0x2a   : > { %s1944_s16 = smov [#allocation5]   ;;  %p2561_p2 = scmp.ne.s32.totalorder %s2559_s30, 0 }
  0x2b   : > { %1785 = dma.vmem_to_smem (!%p2045_p12), %s191_s11, 16, %s1944_s16, [#allocation6]  }
  0x2c   : > { %221 = sbr.rel (%p2561_p2) target bundleno = 1068 (0x42c), region = 40  ;;  %p2562_p3 = scmp.eq.s32.totalorder (!%p2561_p2), %s2003_s22, 0 }
  0x31   : > { %1916 = dma.done.wait (%p2562_p3), [#allocation4], 16   ;;  %p2563_p4 = pmov %p2562_p3 }
  0x32   : > { %p2564_p9 = pmov %p2562_p3 }
  0x33   : > { %1918 = vsyncadd (%p2563_p4), [#allocation4], 4294967280 }
  0x34   : > { %1920 = dma.done.wait (%p2564_p9), [#allocation6], 16   ;;  %p2565_p5 = pmov %p2562_p3 }
  0x36   : > { %1922 = vsyncadd (%p2565_p5), [#allocation6], 4294967280 }
  0x37   : > { %231 = sfence }
  0x38   : > { %p258_p6 = scmp.lt.s32.totalorder %s2003_s22, 1  ;;  %v277_v0 = vlaneseq  ;;  %v1945_v19 = vmov 0.0   ;;  %vm1946_vm0 = vmmov 0   ;;  %vm341_vm1 = vcmask 126976   ;;  %s2106_s10 = sld [smem:[#allocation2]] }
  0x39   : > { %1748 = vmatprep.subr.mxu0 %v1945_v19  ;;  %1753 = vmatprep.subr.mxu1 %v1945_v19  ;;  %s408_s11 = sld [smem:[#allocation5]]  ;;  %vm466_vm2 = vcmask 1041409   ;;  %vm468_vm3 = vcmask 1042434   ;;  %vm470_vm4 = vcmask 1043459   ;;  %vm472_vm5 = vcmask 1044484   ;;  %s255_s12 = sand.u32 1, %s1933_s19  }
  0x3a   : > { %s2067_s17 = scalar_select %p258_p6, %s2003_s22, 1  ;;  %v2069_v1 = vshrl.u32 %v277_v0, 7  ;;  %1750 = vmatprep.mubr.msk.f32.mxu0 %vm1946_vm0, %v1945_v19  ;;  %1755 = vmatprep.mubr.msk.f32.mxu1 %vm1946_vm0, %v1945_v19  ;;  %vm474_vm6 = vcmask 1045509   ;;  %vm476_vm7 = vcmask 1046534   ;;  %vm478_vm8 = vcmask 1047559  }
  0x3b   : > { %vm481_vm9 = vcmask 130048   ;;  %s1768_s13 = smul.u32 40, %s255_s12  ;;  %vm483_vm10 = vcmask 64512   ;;  %s1725_s25 = sld [smem:[#allocation2 + $0x2]] }
  0x3c   : > { %s1719_s23 = sshll.u32 %s2067_s17, 3  ;;  %v2073_v2 = vsub.s32 0, %v2069_v1  ;;  %v293_v3 = vsub.s32 2, %v2069_v1  ;;  %v300_v4 = vsub.s32 3, %v2069_v1  ;;  %v286_v5 = vsub.s32 1, %v2069_v1  ;;  %s1739_s6 = sshll.u32 %s2067_s17, 6 }
  0x3d   : > { %s266_s30 = scalar_lea.vmem %s2552_s4, %s1719_s23  ;;  %v314_v11 = vsub.s32 5, %v2069_v1  ;;  %v307_v12 = vsub.s32 4, %v2069_v1  ;;  %v328_v15 = vsub.s32 7, %v2069_v1  ;;  %v321_v16 = vsub.s32 6, %v2069_v1  ;;  %s2096_s9 = scalar_lea.vmem %s2551_s3, %s1739_s6 }
  0x3e   : > { %v276_v6 = vld [vmem:[%s266_s30] sm:$0xff]  ;;  %v2099_v20 = vld [vmem:[%s2096_s9 + $0x10] sm:$0x1f]  ;;  %v2109_v26 = vld [vmem:[%s2096_s9 + $0x18] sm:$0x1f]  ;;  %v2135_v56 = vstv %s2106_s10  ;;  %s2240_s16 = scalar_lea.vmem [#allocation7], %s1768_s13 }
  0x3f   : > { %v294_v7 = vrot.slane %v276_v6, %v293_v3  ;;  %v280_v8 = vrot.slane %v276_v6, %v2073_v2  ;;  %v301_v9 = vrot.slane %v276_v6, %v300_v4  ;;  %v287_v10 = vrot.slane %v276_v6, %v286_v5  ;;  %v2102_v21 = vld [vmem:[%s2096_s9] sm:$0x1f]  ;;  %v2112_v27 = vld [vmem:[%s2096_s9 + $0x8] sm:$0x1f]  ;;  %v2129_v54 = vld [vmem:[%s2096_s9 + $0x38] sm:$0x1f] }
  0x40   : > { %v315_v13 = vrot.slane %v276_v6, %v314_v11  ;;  %v308_v14 = vrot.slane %v276_v6, %v307_v12  ;;  %v329_v17 = vrot.slane %v276_v6, %v328_v15  ;;  %v322_v18 = vrot.slane %v276_v6, %v321_v16  ;;  %v2119_v38 = vld [vmem:[%s2096_s9 + $0x28] sm:$0x1f]  ;;  %v2122_v39 = vld [vmem:[%s2096_s9 + $0x20] sm:$0x1f]  ;;  %v2132_v55 = vld [vmem:[%s2096_s9 + $0x30] sm:$0x1f] }
  0x41   : > { %296 = vbcast.lane.b32.xlu1 %v294_v7, 256  ;;  %282 = vbcast.lane.b32.xlu0 %v280_v8, 256  ;;  %v2137_v57 = vstv %s408_s11  ;;  %s1721_s17 = sld [smem:[#allocation2 + $0x1]]  ;;  %s1736_s10 = sshll.u32 %s2003_s22, 7 }
  0x42   : > { %s1722_s23 = sld [smem:[#allocation5 + $0x1]]  ;;  %s2502_s14 = scalar_lea.hbm %s2553_s5, %s1736_s10 }
  0x43   : > { %s1726_s26 = sld [smem:[#allocation5 + $0x2]]  ;;  %s2508_s15 = scalar_lea.sflag [#allocation3], %s255_s12 }
  0x44   : > { %s1729_s30 = sld [smem:[#allocation2 + $0x3]]  ;;  %p2566_p12 = scmp.ne.s32.totalorder %s2557_s28, 0 }
  0x45   : > { %303 = vbcast.lane.b32.xlu1 %v301_v9, 256  ;;  %289 = vbcast.lane.b32.xlu0 %v287_v10, 256  ;;  %s1730_s6 = sld [smem:[#allocation5 + $0x3]]  ;;  %s1948_s22 = smov [#allocation7]  }
  0x46   : > { %s1733_s7 = sld [smem:[#allocation2 + $0x4]] }
  0x47   : > { %s1734_s8 = sld [smem:[#allocation5 + $0x4]] }
  0x49   : > { %317 = vbcast.lane.b32.xlu1 %v315_v13, 256  ;;  %310 = vbcast.lane.b32.xlu0 %v308_v14, 256 }
  0x4d   : > { %331 = vbcast.lane.b32.xlu1 %v329_v17, 256  ;;  %324 = vbcast.lane.b32.xlu0 %v322_v18, 256 }
  0xb3   : > { %v297_v22 = vpop.permute.xlu1 %296  ;;  %v283_v23 = vpop.permute.xlu0 %282 }
  0xb4   : > { %v335_v24 = vmul.f32 %v297_v22, %v2099_v20  ;;  %v333_v25 = vmul.f32 %v283_v23, %v2102_v21 }
  0xb6   : > { %v356_v28 = vsel %vm341_vm1, %v335_v24, 0.0  ;;  %v342_v29 = vsel %vm341_vm1, %v333_v25, 0.0 }
  0xb7   : > { %v357_v30 = vrot.slane %v356_v28, 4  ;;  %v343_v31 = vrot.slane %v342_v29, 4  ;;  %v304_v32 = vpop.permute.xlu1 %303  ;;  %v290_v33 = vpop.permute.xlu0 %289 }
  0xb8   : > { %v336_v34 = vmul.f32 %v304_v32, %v2109_v26  ;;  %v334_v35 = vmul.f32 %v290_v33, %v2112_v27 }
  0xb9   : > { %v358_v36 = vadd.f32 %v357_v30, %v356_v28  ;;  %v344_v37 = vadd.f32 %v343_v31, %v342_v29 }
  0xba   : > { %v363_v40 = vsel %vm341_vm1, %v336_v34, 0.0  ;;  %v349_v41 = vsel %vm341_vm1, %v334_v35, 0.0 }
  0xbb   : > { %v359_v42 = vrot.slane %v358_v36, 2  ;;  %v345_v43 = vrot.slane %v344_v37, 2  ;;  %v364_v44 = vrot.slane %v363_v40, 4  ;;  %v350_v45 = vrot.slane %v349_v41, 4  ;;  %v318_v46 = vpop.permute.xlu1 %317  ;;  %v311_v47 = vpop.permute.xlu0 %310 }
  0xbc   : > { %v338_v48 = vmul.f32 %v318_v46, %v2119_v38  ;;  %v337_v49 = vmul.f32 %v311_v47, %v2122_v39 }
  0xbd   : > { %v360_v50 = vadd.f32 %v359_v42, %v358_v36  ;;  %v346_v51 = vadd.f32 %v345_v43, %v344_v37  ;;  %v365_v52 = vadd.f32 %v364_v44, %v363_v40  ;;  %v351_v53 = vadd.f32 %v350_v45, %v349_v41 }
  0xbe   : > { %v377_v58 = vsel %vm341_vm1, %v338_v48, 0.0  ;;  %v370_v59 = vsel %vm341_vm1, %v337_v49, 0.0 }
  0xbf   : > { %v361_v60 = vrot.slane %v360_v50, 1  ;;  %v347_v61 = vrot.slane %v346_v51, 1  ;;  %v366_v62 = vrot.slane %v365_v52, 2  ;;  %v352_v63 = vrot.slane %v351_v53, 2  ;;  %v332_v0 = vpop.permute.xlu1 %331  ;;  %v325_v3 = vpop.permute.xlu0 %324 }
  0xc0   : > { %v378_v4 = vrot.slane %v377_v58, 4  ;;  %v371_v5 = vrot.slane %v370_v59, 4  ;;  %v340_v6 = vmul.f32 %v332_v0, %v2129_v54  ;;  %v339_v7 = vmul.f32 %v325_v3, %v2132_v55 }
  0xc1   : > { %v362_v8 = vadd.f32 %v361_v60, %v360_v50  ;;  %v348_v9 = vadd.f32 %v347_v61, %v346_v51  ;;  %v367_v10 = vadd.f32 %v366_v62, %v365_v52  ;;  %v353_v11 = vadd.f32 %v352_v63, %v351_v53 }
  0xc2   : > { %v379_v12 = vadd.f32 %v378_v4, %v377_v58  ;;  %v372_v13 = vadd.f32 %v371_v5, %v370_v59  ;;  %v391_v14 = vsel %vm341_vm1, %v340_v6, 0.0  ;;  %v384_v15 = vsel %vm341_vm1, %v339_v7, 0.0 }
  0xc3   : > { %v400_v16 = vmul.f32 %v2135_v56, %v348_v9  ;;  %v368_v17 = vrot.slane %v367_v10, 1  ;;  %v354_v18 = vrot.slane %v353_v11, 1  ;;  %v392_v24 = vrot.slane %v391_v14, 4 }
  0xc4   : > { %v380_v22 = vrot.slane %v379_v12, 2  ;;  %v373_v23 = vrot.slane %v372_v13, 2  ;;  %v385_v25 = vrot.slane %v384_v15, 4  ;;  %v2147_v28 = vmul.f32 %v2135_v56, %v362_v8 }
  0xc5   : > { %v355_v29 = vadd.f32 %v354_v18, %v353_v11  ;;  %v410_v30 = vsub.f32 %v400_v16, %v2137_v57  ;;  %v426_v31 = vsub.f32 0.0, %v400_v16  ;;  %v393_v34 = vadd.f32 %v392_v24, %v391_v14 }
  0xc6   : > { %v381_v32 = vadd.f32 %v380_v22, %v379_v12  ;;  %v374_v33 = vadd.f32 %v373_v23, %v372_v13  ;;  %v386_v35 = vadd.f32 %v385_v25, %v384_v15  ;;  %v369_v36 = vadd.f32 %v368_v17, %v367_v10 }
  0xc7   : > { %v401_v37 = vmul.f32 %v2135_v56, %v355_v29  ;;  %v418_v40 = vmax.f32 %v410_v30, 0.0  ;;  %v434_v41 = vsub.f32 %v426_v31, %v2137_v57  ;;  %v394_v44 = vrot.slane %v393_v34, 2 }
  0xc8   : > { %v382_v42 = vrot.slane %v381_v32, 1  ;;  %v375_v43 = vrot.slane %v374_v33, 1  ;;  %v387_v45 = vrot.slane %v386_v35, 2  ;;  %v2157_v58 = vmul.f32 %v2135_v56, %v369_v36 }
  0xc9   : > { %v2153_v46 = vsel %vm466_vm2, %v401_v37, %v400_v16  ;;  %v442_v47 = vmax.f32 %v434_v41, 0.0  ;;  %v411_v48 = vsub.f32 %v401_v37, %v2137_v57  ;;  %v427_v49 = vsub.f32 0.0, %v401_v37 }
  0xca   : > { %v383_v50 = vadd.f32 %v382_v42, %v381_v32  ;;  %v376_v51 = vadd.f32 %v375_v43, %v374_v33  ;;  %v395_v52 = vadd.f32 %v394_v44, %v393_v34  ;;  %v388_v53 = vadd.f32 %v387_v45, %v386_v35 }
  0xcb   : > { %v450_v59 = vsub.f32 %v418_v40, %v442_v47  ;;  %v419_v60 = vmax.f32 %v411_v48, 0.0  ;;  %v435_v61 = vsub.f32 %v427_v49, %v2137_v57  ;;  %v412_v3 = vsub.f32 %v2147_v28, %v2137_v57 }
  0xcc   : > { %v2161_v62 = vmul.f32 %v2135_v56, %v376_v51  ;;  %v396_v63 = vrot.slane %v395_v52, 1  ;;  %v389_v0 = vrot.slane %v388_v53, 1  ;;  %v2166_v4 = vmul.f32 %v2135_v56, %v383_v50 }
  0xcd   : > { %v557_v5 = vmul.f32 %v450_v59, %v2102_v21  ;;  %v443_v6 = vmax.f32 %v435_v61, 0.0  ;;  %v428_v7 = vsub.f32 0.0, %v2147_v28  ;;  %v413_v17 = vsub.f32 %v2157_v58, %v2137_v57 }
  0xce   : > { %v397_v8 = vadd.f32 %v396_v63, %v395_v52  ;;  %v390_v9 = vadd.f32 %v389_v0, %v388_v53  ;;  %v414_v13 = vsub.f32 %v2161_v62, %v2137_v57  ;;  %v430_v16 = vsub.f32 0.0, %v2161_v62 }
  0xcf   : > { %v565_v10 = vsel %vm341_vm1, %v557_v5, 0.0  ;;  %v451_v11 = vsub.f32 %v419_v60, %v443_v6  ;;  %v436_v12 = vsub.f32 %v428_v7, %v2137_v57  ;;  %v415_v18 = vsub.f32 %v2166_v4, %v2137_v57 }
  0xd0   : > { %v2175_v14 = vmul.f32 %v2135_v56, %v397_v8  ;;  %v2178_v15 = vmul.f32 %v2135_v56, %v390_v9  ;;  %566 = vadd.xlane.f32.xlu0 %v565_v10  ;;  %v420_v23 = vmax.f32 %v412_v3, 0.0  ;;  %v431_v25 = vsub.f32 0.0, %v2166_v4 }
  0xd1   : > { %v558_v22 = vmul.f32 %v451_v11, %v2112_v27  ;;  %v444_v24 = vmax.f32 %v436_v12, 0.0  ;;  %v438_v29 = vsub.f32 %v430_v16, %v2137_v57  ;;  %v429_v30 = vsub.f32 0.0, %v2157_v58 }
  0xd2   : > { %v432_v56 = vsub.f32 0.0, %v2178_v15  ;;  %v467_v32 = vsel %vm466_vm2, %v451_v11, %v450_v59  ;;  %v422_v34 = vmax.f32 %v414_v13, 0.0  ;;  %v421_v36 = vmax.f32 %v413_v17, 0.0 }
  0xd3   : > { %v568_v31 = vsel %vm341_vm1, %v558_v22, 0.0  ;;  %v452_v33 = vsub.f32 %v420_v23, %v444_v24  ;;  %v446_v35 = vmax.f32 %v438_v29, 0.0  ;;  %v437_v37 = vsub.f32 %v429_v30, %v2137_v57  ;;  %v2229_v22 = vld [vmem:[%s2550_s2] sm:$0xff] }
  0xd4   : > { %569 = vadd.xlane.f32.xlu1 %v568_v31  ;;  %v433_v40 = vsub.f32 0.0, %v2175_v14  ;;  %v416_v42 = vsub.f32 %v2178_v15, %v2137_v57  ;;  %v417_v43 = vsub.f32 %v2175_v14, %v2137_v57  ;;  %v423_v44 = vmax.f32 %v415_v18, 0.0 }
  0xd5   : > { %v559_v41 = vmul.f32 %v452_v33, %v2099_v20  ;;  %v454_v45 = vsub.f32 %v422_v34, %v446_v35  ;;  %v445_v47 = vmax.f32 %v437_v37, 0.0  ;;  %v439_v48 = vsub.f32 %v431_v25, %v2137_v57 }
  0xd6   : > { %v440_v49 = vsub.f32 %v432_v56, %v2137_v57  ;;  %v469_v51 = vsel %vm468_vm3, %v452_v33, %v467_v32  ;;  %v441_v52 = vsub.f32 %v433_v40, %v2137_v57  ;;  %v662_v53 = vsel %vm468_vm3, %v2147_v28, %v2153_v46 }
  0xd7   : > { %v571_v50 = vsel %vm341_vm1, %v559_v41, 0.0  ;;  %v561_v59 = vmul.f32 %v454_v45, %v2122_v39  ;;  %v453_v60 = vsub.f32 %v421_v36, %v445_v47  ;;  %v447_v61 = vmax.f32 %v439_v48, 0.0 }
  0xd8   : > { %572 = vadd.xlane.f32.xlu0 %v571_v50  ;;  %v448_v63 = vmax.f32 %v440_v49, 0.0  ;;  %v424_v0 = vmax.f32 %v416_v42, 0.0  ;;  %v425_v3 = vmax.f32 %v417_v43, 0.0  ;;  %v449_v5 = vmax.f32 %v441_v52, 0.0 }
  0xd9   : > { %v663_v6 = vsel %vm470_vm4, %v2157_v58, %v662_v53  ;;  %v577_v57 = vsel %vm341_vm1, %v561_v59, 0.0  ;;  %v560_v7 = vmul.f32 %v453_v60, %v2109_v26  ;;  %v471_v28 = vsel %vm470_vm4, %v453_v60, %v469_v51 }
  0xda   : > { %v455_v46 = vsub.f32 %v423_v44, %v447_v61  ;;  %578 = vadd.xlane.f32.xlu1 %v577_v57  ;;  %v456_v8 = vsub.f32 %v424_v0, %v448_v63  ;;  %v457_v9 = vsub.f32 %v425_v3, %v449_v5  ;;  %v473_v10 = vsel %vm472_vm5, %v454_v45, %v471_v28 }
  0xdb   : > { %v664_v11 = vsel %vm472_vm5, %v2161_v62, %v663_v6  ;;  %v574_v12 = vsel %vm341_vm1, %v560_v7, 0.0 }
  0xdc   : > { %v475_v13 = vsel %vm474_vm6, %v455_v46, %v473_v10  ;;  %v562_v58 = vmul.f32 %v455_v46, %v2119_v38  ;;  %v665_v16 = vsel %vm474_vm6, %v2166_v4, %v664_v11  ;;  %575 = vadd.xlane.f32.xlu0 %v574_v12  ;;  %v563_v18 = vmul.f32 %v456_v8, %v2132_v55 }
  0xdd   : > { %v477_v17 = vsel %vm476_vm7, %v456_v8, %v475_v13  ;;  %v666_v62 = vsel %vm476_vm7, %v2178_v15, %v665_v16  ;;  %v564_v25 = vmul.f32 %v457_v9, %v2129_v54 }
  0xde   : > { %v2234_v23 = vsel %vm478_vm8, %v457_v9, %v477_v17  ;;  %v2238_v4 = vsel %vm478_vm8, %v2175_v14, %v666_v62  ;;  %v583_v24 = vsel %vm341_vm1, %v563_v18, 0.0  ;;  %v580_v15 = vsel %vm341_vm1, %v562_v58, 0.0 }
  0xdf   : > { %482 = vst.msk [vmem:[%s2240_s16] sm:$0xff] %vm481_vm9, %v2234_v23  ;;  %1749 = vmatpush3.msra.mxu0 %v2234_v23  ;;  %584 = vadd.xlane.f32.xlu1 %v583_v24  ;;  %v586_v14 = vsel %vm341_vm1, %v564_v25, 0.0 }
  0xe0   : > { %1751 = vmatmul.mubr.msk.f32.vlgmr.msra.gmra.mxu0 %vm483_vm10, %v2229_v22  ;;  %581 = vadd.xlane.f32.xlu0 %v580_v15 }
  0xe1   : > { %1758 = vmatprep.subr.mxu0 %v1945_v19  ;;  %1760 = vmatprep.mubr.msk.f32.mxu0 %vm1946_vm0, %v1945_v19 }
  0xe4   : > { %587 = vadd.xlane.f32.xlu0 %v586_v14 }
 0x159   : > { %v567_v56 = vpop.xlane.xlu0 %566 }
 0x15a   : > { %v589_v33 = vmul.f32 %v567_v56, %v2102_v21 }
 0x15c   : > { %v597_v41 = vsel %vm341_vm1, %v589_v33, 0.0 }
 0x15d   : > { %v570_v30 = vpop.xlane.xlu1 %569  ;;  %v598_v49 = vrot.slane %v597_v41, 4 }
 0x15e   : > { %v590_v32 = vmul.f32 %v570_v30, %v2112_v27 }
 0x15f   : > { %v599_v0 = vadd.f32 %v598_v49, %v597_v41 }
 0x160   : > { %v604_v37 = vsel %vm341_vm1, %v590_v32, 0.0 }
 0x161   : > { %v573_v29 = vpop.xlane.xlu0 %572  ;;  %v605_v42 = vrot.slane %v604_v37, 4  ;;  %v600_v8 = vrot.slane %v599_v0, 2 }
 0x162   : > { %v591_v35 = vmul.f32 %v573_v29, %v2099_v20 }
 0x163   : > { %v579_v34 = vpop.xlane.xlu1 %578  ;;  %v606_v52 = vadd.f32 %v605_v42, %v604_v37  ;;  %v601_v17 = vadd.f32 %v600_v8, %v599_v0 }
 0x164   : > { %v611_v43 = vsel %vm341_vm1, %v591_v35, 0.0  ;;  %v593_v44 = vmul.f32 %v579_v34, %v2122_v39 }
 0x165   : > { %v576_v31 = vpop.xlane.xlu0 %575  ;;  %v612_v51 = vrot.slane %v611_v43, 4  ;;  %v607_v6 = vrot.slane %v606_v52, 2  ;;  %v602_v29 = vrot.slane %v601_v17, 1 }
 0x166   : > { %v592_v40 = vmul.f32 %v576_v31, %v2109_v26  ;;  %v625_v53 = vsel %vm341_vm1, %v593_v44, 0.0 }
 0x167   : > { %v613_v3 = vadd.f32 %v612_v51, %v611_v43  ;;  %v626_v5 = vrot.slane %v625_v53, 4  ;;  %v608_v12 = vadd.f32 %v607_v6, %v606_v52  ;;  %v603_v37 = vadd.f32 %v602_v29, %v601_v17 }
 0x168   : > { %v618_v45 = vsel %vm341_vm1, %v592_v40, 0.0  ;;  %v585_v47 = vpop.xlane.xlu1 %584  ;;  %v671_v40 = vstv %s1721_s17 }
 0x169   : > { %v582_v36 = vpop.xlane.xlu0 %581  ;;  %v619_v59 = vrot.slane %v618_v45, 4  ;;  %v595_v60 = vmul.f32 %v585_v47, %v2132_v55  ;;  %v614_v9 = vrot.slane %v613_v3, 2  ;;  %v627_v10 = vadd.f32 %v626_v5, %v625_v53 }
 0x16a   : > { %v594_v48 = vmul.f32 %v582_v36, %v2119_v38  ;;  %v609_v15 = vrot.slane %v608_v12, 1  ;;  %v672_v49 = vmul.f32 %v671_v40, %v603_v37 }
 0x16b   : > { %v620_v57 = vadd.f32 %v619_v59, %v618_v45  ;;  %v639_v7 = vsel %vm341_vm1, %v595_v60, 0.0  ;;  %v615_v18 = vadd.f32 %v614_v9, %v613_v3  ;;  %v628_v62 = vrot.slane %v627_v10, 2 }
 0x16c   : > { %v632_v61 = vsel %vm341_vm1, %v594_v48, 0.0  ;;  %v640_v11 = vrot.slane %v639_v7, 4  ;;  %v610_v33 = vadd.f32 %v609_v15, %v608_v12 }
 0x16d   : > { %v588_v50 = vpop.xlane.xlu0 %587  ;;  %v633_v28 = vrot.slane %v632_v61, 4  ;;  %v621_v13 = vrot.slane %v620_v57, 2  ;;  %v616_v30 = vrot.slane %v615_v18, 1  ;;  %v629_v31 = vadd.f32 %v628_v62, %v627_v10 }
 0x16e   : > { %v596_v63 = vmul.f32 %v588_v50, %v2129_v54  ;;  %v641_v24 = vadd.f32 %v640_v11, %v639_v7  ;;  %v673_v44 = vmul.f32 %v671_v40, %v610_v33 }
 0x16f   : > { %v634_v58 = vadd.f32 %v633_v28, %v632_v61  ;;  %v622_v25 = vadd.f32 %v621_v13, %v620_v57  ;;  %v617_v41 = vadd.f32 %v616_v30, %v615_v18  ;;  %v630_v42 = vrot.slane %v629_v31, 1 }
 0x170   : > { %v646_v46 = vsel %vm341_vm1, %v596_v63, 0.0  ;;  %v642_v32 = vrot.slane %v641_v24, 2  ;;  %v688_v53 = vsel %vm466_vm2, %v673_v44, %v672_v49  ;;  %v698_v13 = vstv %s1722_s23  ;;  %s1877_s23 = sshll.u32 %s1948_s22, 4  ;;  %s1878_s23 = int_to_ptr.vmem [resolvable:$false] %s1877_s23 }
 0x171   : > { %v647_v16 = vrot.slane %v646_v46, 4  ;;  %v635_v14 = vrot.slane %v634_v58, 2  ;;  %v623_v34 = vrot.slane %v622_v25, 1  ;;  %v674_v50 = vmul.f32 %v671_v40, %v617_v41 }
 0x172   : > { %v643_v43 = vadd.f32 %v642_v32, %v641_v24  ;;  %v631_v51 = vadd.f32 %v630_v42, %v629_v31 }
 0x173   : > { %v648_v56 = vadd.f32 %v647_v16, %v646_v46  ;;  %v636_v35 = vadd.f32 %v635_v14, %v634_v58  ;;  %v624_v45 = vadd.f32 %v623_v34, %v622_v25  ;;  %v689_v63 = vsel %vm468_vm3, %v674_v50, %v688_v53 }
 0x174   : > { %v644_v52 = vrot.slane %v643_v43, 1  ;;  %v676_v0 = vmul.f32 %v671_v40, %v631_v51  ;;  %v1947_v16 = vmov 1966171168  }
 0x175   : > { %v649_v36 = vrot.slane %v648_v56, 2  ;;  %v637_v47 = vrot.slane %v636_v35, 1  ;;  %v675_v59 = vmul.f32 %v671_v40, %v624_v45  ;;  %v781_v17 = vunpack.c.l.s4 %v1947_v16 }
 0x176   : > { %v645_v3 = vadd.f32 %v644_v52, %v643_v43 }
 0x177   : > { %v650_v48 = vadd.f32 %v649_v36, %v648_v56  ;;  %v638_v60 = vadd.f32 %v637_v47, %v636_v35  ;;  %v690_v57 = vsel %vm470_vm4, %v675_v59, %v689_v63  ;;  %v782_v15 = vunpack.c.0.s8 %v781_v17 }
 0x178   : > { %v678_v7 = vmul.f32 %v671_v40, %v645_v3  ;;  %v691_v28 = vsel %vm472_vm5, %v676_v0, %v690_v57 }
 0x179   : > { %v651_v61 = vrot.slane %v650_v48, 1  ;;  %v677_v5 = vmul.f32 %v671_v40, %v638_v60 }
 0x17b   : > { %v652_v6 = vadd.f32 %v651_v61, %v650_v48  ;;  %v692_v8 = vsel %vm474_vm6, %v677_v5, %v691_v28 }
 0x17c   : > { %v693_v11 = vsel %vm476_vm7, %v678_v7, %v692_v8 }
 0x17d   : > { %v679_v46 = vmul.f32 %v671_v40, %v652_v6 }
 0x17f   : > { %v694_v12 = vsel %vm478_vm8, %v679_v46, %v693_v11 }
 0x1a0   : > { %v2276_v9 = vpop.f32.mrf.mxu0 }
 0x1a1   : > { %v669_v10 = vadd.f32 %v2238_v4, %v2276_v9  ;;  %v2287_v4 = vsub.s32 %v782_v15, %v2069_v1 }
 0x1a2   : > { %v1752_v58 = vpop.f32.mrf.mxu0 }
 0x1a3   : > { %v2282_v18 = vsub.f32 %v669_v10, %v694_v12 }
 0x1a5   : > { %v699_v62 = vsub.f32 %v2282_v18, %v698_v13  ;;  %v701_v24 = vsub.f32 0.0, %v2282_v18 }
 0x1a7   : > { %v702_v25 = vsub.f32 %v701_v24, %v698_v13  ;;  %v700_v14 = vmax.f32 %v699_v62, 0.0 }
 0x1a9   : > { %v703_v56 = vmax.f32 %v702_v25, 0.0 }
 0x1ab   : > { %v2289_v29 = vsub.f32 %v700_v14, %v703_v56 }
 0x1ad   : > { %1723 = vst.msk [vmem:[%s2240_s16 + $0x8] sm:$0xff] %vm481_vm9, %v2289_v29  ;;  %1754 = vmatpush3.msra.mxu1 %v2289_v29  ;;  %v777_v30 = vsub.f32 %v2289_v29, %v2234_v23 }
 0x1ae   : > { %1756 = vmatmul.mubr.msk.f32.vlgmr.msra.gmra.mxu1 %vm483_vm10, %v2229_v22  ;;  %1763 = vmatprep.subr.mxu1 %v1945_v19 }
 0x1af   : > { %v786_v31 = vrot.slane %v777_v30, %v2287_v4  ;;  %v779_v32 = vcombine.high %v777_v30, %v777_v30  ;;  %1765 = vmatprep.mubr.msk.f32.mxu1 %vm1946_vm0, %v1945_v19 }
 0x1b1   : > { %v802_v1 = vrot.slane %v786_v31, %v2287_v4  ;;  %v794_v33 = vcombine.high %v786_v31, %v786_v31  ;;  %v793_v34 = vrot.slane %v779_v32, %v2287_v4 }
 0x1b3   : > { %v831_v35 = vrot.slane %v802_v1, %v2073_v2  ;;  %v816_v36 = vrot.slane %v794_v33, %v2287_v4  ;;  %v824_v37 = vcombine.high %v802_v1, %v802_v1  ;;  %v809_v40 = vrot.slane %v793_v34, %v2287_v4 }
 0x1b4   : > { %v795_v41 = vcombine.high %v793_v34, %v793_v34 }
 0x1b5   : > { %v868_v42 = vmul.f32 %v831_v35, %v2102_v21  ;;  %v835_v43 = vrot.slane %v816_v36, %v2073_v2  ;;  %v839_v44 = vrot.slane %v824_v37, %v2073_v2  ;;  %v826_v19 = vcombine.high %v816_v36, %v816_v36 }
 0x1b6   : > { %v847_v45 = vrot.slane %v809_v40, %v2073_v2  ;;  %v823_v47 = vrot.slane %v795_v41, %v2287_v4  ;;  %v825_v48 = vcombine.high %v809_v40, %v809_v40 }
 0x1b7   : > { %v876_v49 = vsel %vm341_vm1, %v868_v42, 0.0  ;;  %v869_v50 = vmul.f32 %v835_v43, %v2112_v27  ;;  %v870_v51 = vmul.f32 %v839_v44, %v2099_v20  ;;  %v843_v52 = vrot.slane %v826_v19, %v2073_v2 }
 0x1b8   : > { %877 = vadd.xlane.f32.xlu1 %v876_v49  ;;  %v851_v60 = vrot.slane %v823_v47, %v2073_v2  ;;  %v827_v61 = vcombine.high %v823_v47, %v823_v47  ;;  %v872_v0 = vmul.f32 %v847_v45, %v2122_v39  ;;  %v855_v3 = vrot.slane %v825_v48, %v2073_v2 }
 0x1b9   : > { %v879_v53 = vsel %vm341_vm1, %v869_v50, 0.0  ;;  %v871_v59 = vmul.f32 %v843_v52, %v2109_v26  ;;  %v882_v63 = vsel %vm341_vm1, %v870_v51, 0.0 }
 0x1ba   : > { %880 = vadd.xlane.f32.xlu0 %v879_v53  ;;  %v873_v6 = vmul.f32 %v851_v60, %v2119_v38  ;;  %v859_v57 = vrot.slane %v827_v61, %v2073_v2  ;;  %v888_v7 = vsel %vm341_vm1, %v872_v0, 0.0  ;;  %v874_v28 = vmul.f32 %v855_v3, %v2132_v55 }
 0x1bb   : > { %v885_v5 = vsel %vm341_vm1, %v871_v59, 0.0 }
 0x1bc   : > { %883 = vadd.xlane.f32.xlu1 %v882_v63  ;;  %v891_v46 = vsel %vm341_vm1, %v873_v6, 0.0  ;;  %v875_v8 = vmul.f32 %v859_v57, %v2129_v54  ;;  %v894_v10 = vsel %vm341_vm1, %v874_v28, 0.0 }
 0x1be   : > { %886 = vadd.xlane.f32.xlu0 %v885_v5  ;;  %v897_v11 = vsel %vm341_vm1, %v875_v8, 0.0 }
 0x1c0   : > { %889 = vadd.xlane.f32.xlu1 %v888_v7 }
 0x1c2   : > { %892 = vadd.xlane.f32.xlu0 %v891_v46 }
 0x1c4   : > { %895 = vadd.xlane.f32.xlu1 %v894_v10 }
 0x1c6   : > { %898 = vadd.xlane.f32.xlu0 %v897_v11 }
 0x241   : > { %v878_v12 = vpop.xlane.xlu1 %877 }
 0x242   : > { %v900_v13 = vmul.f32 %v878_v12, %v2102_v21 }
 0x243   : > { %v881_v58 = vpop.xlane.xlu0 %880 }
 0x244   : > { %v908_v16 = vsel %vm341_vm1, %v900_v13, 0.0  ;;  %v901_v17 = vmul.f32 %v881_v58, %v2112_v27 }
 0x245   : > { %v909_v62 = vrot.slane %v908_v16, 4  ;;  %v884_v24 = vpop.xlane.xlu1 %883 }
 0x246   : > { %v915_v15 = vsel %vm341_vm1, %v901_v17, 0.0  ;;  %v902_v25 = vmul.f32 %v884_v24, %v2099_v20 }
 0x247   : > { %v916_v14 = vrot.slane %v915_v15, 4  ;;  %v887_v56 = vpop.xlane.xlu0 %886  ;;  %v910_v32 = vadd.f32 %v909_v62, %v908_v16 }
 0x248   : > { %v922_v30 = vsel %vm341_vm1, %v902_v25, 0.0  ;;  %v903_v31 = vmul.f32 %v887_v56, %v2109_v26  ;;  %v969_v25 = vstv %s1725_s25  ;;  %s1879_s25 = scalar_lea.vmem %s1878_s23, 1280 }
 0x249   : > { %v917_v1 = vadd.f32 %v916_v14, %v915_v15  ;;  %v923_v33 = vrot.slane %v922_v30, 4  ;;  %v890_v34 = vpop.xlane.xlu1 %889  ;;  %v911_v19 = vrot.slane %v910_v32, 2 }
 0x24a   : > { %v929_v35 = vsel %vm341_vm1, %v903_v31, 0.0  ;;  %v904_v36 = vmul.f32 %v890_v34, %v2122_v39 }
 0x24b   : > { %v924_v37 = vadd.f32 %v923_v33, %v922_v30  ;;  %v930_v40 = vrot.slane %v929_v35, 4  ;;  %v893_v41 = vpop.xlane.xlu0 %892  ;;  %v918_v42 = vrot.slane %v917_v1, 2  ;;  %v912_v0 = vadd.f32 %v911_v19, %v910_v32 }
 0x24c   : > { %v936_v43 = vsel %vm341_vm1, %v904_v36, 0.0  ;;  %v905_v44 = vmul.f32 %v893_v41, %v2119_v38 }
 0x24d   : > { %v896_v45 = vpop.xlane.xlu1 %895  ;;  %v931_v47 = vadd.f32 %v930_v40, %v929_v35  ;;  %v937_v48 = vrot.slane %v936_v43, 4  ;;  %v925_v51 = vrot.slane %v924_v37, 2  ;;  %v919_v53 = vadd.f32 %v918_v42, %v917_v1 }
 0x24e   : > { %v943_v49 = vsel %vm341_vm1, %v905_v44, 0.0  ;;  %v906_v50 = vmul.f32 %v896_v45, %v2132_v55  ;;  %v913_v8 = vrot.slane %v912_v0, 1 }
 0x24f   : > { %v899_v52 = vpop.xlane.xlu0 %898  ;;  %v944_v59 = vrot.slane %v943_v49, 4  ;;  %v938_v63 = vadd.f32 %v937_v48, %v936_v43  ;;  %v932_v3 = vrot.slane %v931_v47, 2  ;;  %v926_v5 = vadd.f32 %v925_v51, %v924_v37 }
 0x250   : > { %v950_v60 = vsel %vm341_vm1, %v906_v50, 0.0  ;;  %v907_v61 = vmul.f32 %v899_v52, %v2129_v54  ;;  %v920_v7 = vrot.slane %v919_v53, 1  ;;  %v914_v62 = vadd.f32 %v913_v8, %v912_v0 }
 0x251   : > { %v951_v6 = vrot.slane %v950_v60, 4  ;;  %v945_v28 = vadd.f32 %v944_v59, %v943_v49  ;;  %v939_v46 = vrot.slane %v938_v63, 2  ;;  %v933_v10 = vadd.f32 %v932_v3, %v931_v47 }
 0x252   : > { %v957_v57 = vsel %vm341_vm1, %v907_v61, 0.0  ;;  %v927_v12 = vrot.slane %v926_v5, 1  ;;  %v921_v58 = vadd.f32 %v920_v7, %v919_v53  ;;  %v970_v1 = vmul.f32 %v969_v25, %v914_v62 }
 0x253   : > { %v958_v11 = vrot.slane %v957_v57, 4  ;;  %v952_v13 = vadd.f32 %v951_v6, %v950_v60  ;;  %v946_v16 = vrot.slane %v945_v28, 2  ;;  %v940_v17 = vadd.f32 %v939_v46, %v938_v63 }
 0x254   : > { %v934_v24 = vrot.slane %v933_v10, 1  ;;  %v928_v14 = vadd.f32 %v927_v12, %v926_v5  ;;  %v971_v30 = vmul.f32 %v969_v25, %v921_v58  ;;  %v965_v59 = vadd.f32 %v2276_v9, %v2234_v23 }
 0x255   : > { %v959_v15 = vadd.f32 %v958_v11, %v957_v57  ;;  %v953_v56 = vrot.slane %v952_v13, 2  ;;  %v947_v31 = vadd.f32 %v946_v16, %v945_v28  ;;  %v941_v32 = vrot.slane %v940_v17, 1 }
 0x256   : > { %v935_v33 = vadd.f32 %v934_v24, %v933_v10  ;;  %v972_v35 = vmul.f32 %v969_v25, %v928_v14  ;;  %v986_v37 = vsel %vm466_vm2, %v971_v30, %v970_v1  ;;  %v966_v3 = vmul.f32 0.5, %v965_v59 }
 0x257   : > { %v960_v34 = vrot.slane %v959_v15, 2  ;;  %v954_v36 = vadd.f32 %v953_v56, %v952_v13  ;;  %v948_v40 = vrot.slane %v947_v31, 1  ;;  %v942_v41 = vadd.f32 %v941_v32, %v940_v17 }
 0x258   : > { %v973_v42 = vmul.f32 %v969_v25, %v935_v33  ;;  %v987_v44 = vsel %vm468_vm3, %v972_v35, %v986_v37  ;;  %v996_v46 = vstv %s1726_s26 }
 0x259   : > { %v961_v43 = vadd.f32 %v960_v34, %v959_v15  ;;  %v955_v19 = vrot.slane %v954_v36, 1  ;;  %v949_v45 = vadd.f32 %v948_v40, %v947_v31  ;;  %v974_v47 = vmul.f32 %v969_v25, %v942_v41 }
 0x25a   : > { %v988_v48 = vsel %vm470_vm4, %v973_v42, %v987_v44 }
 0x25b   : > { %v962_v49 = vrot.slane %v961_v43, 1  ;;  %v956_v50 = vadd.f32 %v955_v19, %v954_v36  ;;  %v975_v51 = vmul.f32 %v969_v25, %v949_v45  ;;  %v989_v52 = vsel %vm472_vm5, %v974_v47, %v988_v48 }
 0x25d   : > { %v963_v53 = vadd.f32 %v962_v49, %v961_v43  ;;  %v976_v60 = vmul.f32 %v969_v25, %v956_v50  ;;  %v990_v61 = vsel %vm474_vm6, %v975_v51, %v989_v52 }
 0x25f   : > { %v977_v63 = vmul.f32 %v969_v25, %v963_v53  ;;  %v991_v6 = vsel %vm476_vm7, %v976_v60, %v990_v61 }
 0x261   : > { %v992_v28 = vsel %vm478_vm8, %v977_v63, %v991_v6 }
 0x26e   : > { %v2355_v0 = vpop.f32.mrf.mxu1 }
 0x26f   : > { %v964_v5 = vadd.f32 %v2355_v0, %v2282_v18 }
 0x270   : > { %v1757_v57 = vpop.f32.mrf.mxu1 }
 0x271   : > { %v967_v7 = vsub.f32 %v964_v5, %v966_v3 }
 0x273   : > { %v2361_v8 = vsub.f32 %v967_v7, %v992_v28 }
 0x275   : > { %v997_v23 = vsub.f32 %v2361_v8, %v996_v46  ;;  %v999_v9 = vsub.f32 0.0, %v2361_v8 }
 0x277   : > { %v1000_v10 = vsub.f32 %v999_v9, %v996_v46  ;;  %v998_v11 = vmax.f32 %v997_v23, 0.0  ;;  %v2410_v9 = vld [vmem:[%s2096_s9 + $0x10] sm:$0x1f] }
 0x279   : > { %v1001_v12 = vmax.f32 %v1000_v10, 0.0 }
 0x27b   : > { %v2365_v13 = vsub.f32 %v998_v11, %v1001_v12 }
 0x27d   : > { %1727 = vst.msk [vmem:[%s2240_s16 + $0x10] sm:$0xff] %vm481_vm9, %v2365_v13  ;;  %1759 = vmatpush3.msra.mxu0 %v2365_v13  ;;  %v1075_v18 = vsub.f32 %v2365_v13, %v2289_v29 }
 0x27e   : > { %1761 = vmatmul.mubr.msk.f32.vlgmr.msra.gmra.mxu0 %vm483_vm10, %v2229_v22 }
 0x27f   : > { %v1084_v58 = vrot.slane %v1075_v18, %v2287_v4  ;;  %v1077_v16 = vcombine.high %v1075_v18, %v1075_v18 }
 0x281   : > { %v1100_v17 = vrot.slane %v1084_v58, %v2287_v4  ;;  %v1092_v62 = vcombine.high %v1084_v58, %v1084_v58  ;;  %v1091_v24 = vrot.slane %v1077_v16, %v2287_v4 }
 0x283   : > { %v1129_v15 = vrot.slane %v1100_v17, %v2073_v2  ;;  %v1114_v25 = vrot.slane %v1092_v62, %v2287_v4  ;;  %v1122_v14 = vcombine.high %v1100_v17, %v1100_v17  ;;  %v1107_v56 = vrot.slane %v1091_v24, %v2287_v4 }
 0x284   : > { %v1093_v30 = vcombine.high %v1091_v24, %v1091_v24 }
 0x285   : > { %v1166_v31 = vmul.f32 %v1129_v15, %v2102_v21  ;;  %v1133_v32 = vrot.slane %v1114_v25, %v2073_v2  ;;  %v1137_v1 = vrot.slane %v1122_v14, %v2073_v2  ;;  %v1124_v33 = vcombine.high %v1114_v25, %v1114_v25 }
 0x286   : > { %v1145_v34 = vrot.slane %v1107_v56, %v2073_v2  ;;  %v1121_v35 = vrot.slane %v1093_v30, %v2287_v4  ;;  %v1123_v36 = vcombine.high %v1107_v56, %v1107_v56 }
 0x287   : > { %v1174_v37 = vsel %vm341_vm1, %v1166_v31, 0.0  ;;  %v1167_v40 = vmul.f32 %v1133_v32, %v2112_v27  ;;  %v1168_v41 = vmul.f32 %v1137_v1, %v2099_v20  ;;  %v1141_v42 = vrot.slane %v1124_v33, %v2073_v2 }
 0x288   : > { %1175 = vadd.xlane.f32.xlu1 %v1174_v37  ;;  %v1149_v19 = vrot.slane %v1121_v35, %v2073_v2  ;;  %v1125_v45 = vcombine.high %v1121_v35, %v1121_v35  ;;  %v1170_v48 = vmul.f32 %v1145_v34, %v2122_v39  ;;  %v1153_v49 = vrot.slane %v1123_v36, %v2073_v2 }
 0x289   : > { %v1177_v43 = vsel %vm341_vm1, %v1167_v40, 0.0  ;;  %v1169_v44 = vmul.f32 %v1141_v42, %v2109_v26  ;;  %v1180_v47 = vsel %vm341_vm1, %v1168_v41, 0.0 }
 0x28a   : > { %1178 = vadd.xlane.f32.xlu0 %v1177_v43  ;;  %v1171_v50 = vmul.f32 %v1149_v19, %v2119_v38  ;;  %v1157_v51 = vrot.slane %v1125_v45, %v2073_v2  ;;  %v1186_v52 = vsel %vm341_vm1, %v1170_v48, 0.0  ;;  %v1172_v53 = vmul.f32 %v1153_v49, %v2132_v55 }
 0x28b   : > { %v1183_v20 = vsel %vm341_vm1, %v1169_v44, 0.0 }
 0x28c   : > { %1181 = vadd.xlane.f32.xlu1 %v1180_v47  ;;  %v1189_v59 = vsel %vm341_vm1, %v1171_v50, 0.0  ;;  %v1173_v60 = vmul.f32 %v1157_v51, %v2129_v54  ;;  %v1192_v61 = vsel %vm341_vm1, %v1172_v53, 0.0 }
 0x28e   : > { %1184 = vadd.xlane.f32.xlu0 %v1183_v20  ;;  %v1195_v63 = vsel %vm341_vm1, %v1173_v60, 0.0 }
 0x290   : > { %1187 = vadd.xlane.f32.xlu1 %v1186_v52 }
 0x292   : > { %1190 = vadd.xlane.f32.xlu0 %v1189_v59 }
 0x294   : > { %1193 = vadd.xlane.f32.xlu1 %v1192_v61 }
 0x296   : > { %1196 = vadd.xlane.f32.xlu0 %v1195_v63 }
 0x311   : > { %v1176_v3 = vpop.xlane.xlu1 %1175 }
 0x312   : > { %v1198_v5 = vmul.f32 %v1176_v3, %v2102_v21 }
 0x313   : > { %v1179_v6 = vpop.xlane.xlu0 %1178 }
 0x314   : > { %v1206_v57 = vsel %vm341_vm1, %v1198_v5, 0.0  ;;  %v1199_v7 = vmul.f32 %v1179_v6, %v2112_v27  ;;  %v1267_v5 = vstv %s1729_s30 }
 0x315   : > { %v1207_v28 = vrot.slane %v1206_v57, 4  ;;  %v1182_v46 = vpop.xlane.xlu1 %1181 }
 0x316   : > { %v1213_v23 = vsel %vm341_vm1, %v1199_v7, 0.0  ;;  %v1200_v10 = vmul.f32 %v2410_v9, %v1182_v46 }
 0x317   : > { %v1214_v11 = vrot.slane %v1213_v23, 4  ;;  %v1185_v12 = vpop.xlane.xlu0 %1184  ;;  %v1208_v21 = vadd.f32 %v1207_v28, %v1206_v57 }
 0x318   : > { %v1220_v18 = vsel %vm341_vm1, %v1200_v10, 0.0  ;;  %v1201_v58 = vmul.f32 %v1185_v12, %v2109_v26 }
 0x319   : > { %v1215_v16 = vadd.f32 %v1214_v11, %v1213_v23  ;;  %v1221_v17 = vrot.slane %v1220_v18, 4  ;;  %v1188_v62 = vpop.xlane.xlu1 %1187  ;;  %v1209_v32 = vrot.slane %v1208_v21, 2 }
 0x31a   : > { %v1227_v27 = vsel %vm341_vm1, %v1201_v58, 0.0  ;;  %v1202_v24 = vmul.f32 %v1188_v62, %v2122_v39 }
 0x31b   : > { %v1222_v15 = vadd.f32 %v1221_v17, %v1220_v18  ;;  %v1228_v25 = vrot.slane %v1227_v27, 4  ;;  %v1191_v14 = vpop.xlane.xlu0 %1190  ;;  %v1216_v56 = vrot.slane %v1215_v16, 2  ;;  %v1210_v44 = vadd.f32 %v1209_v32, %v1208_v21 }
 0x31c   : > { %v1234_v30 = vsel %vm341_vm1, %v1202_v24, 0.0  ;;  %v1203_v31 = vmul.f32 %v1191_v14, %v2119_v38 }
 0x31d   : > { %v1194_v1 = vpop.xlane.xlu1 %1193  ;;  %v1229_v33 = vadd.f32 %v1228_v25, %v1227_v27  ;;  %v1235_v26 = vrot.slane %v1234_v30, 4  ;;  %v1223_v36 = vrot.slane %v1222_v15, 2  ;;  %v1217_v40 = vadd.f32 %v1216_v56, %v1215_v16 }
 0x31e   : > { %v1241_v34 = vsel %vm341_vm1, %v1203_v31, 0.0  ;;  %v1204_v35 = vmul.f32 %v1194_v1, %v2132_v55  ;;  %v1211_v55 = vrot.slane %v1210_v44, 1 }
 0x31f   : > { %v1197_v37 = vpop.xlane.xlu0 %1196  ;;  %v1242_v39 = vrot.slane %v1241_v34, 4  ;;  %v1236_v43 = vadd.f32 %v1235_v26, %v1234_v30  ;;  %v1230_v19 = vrot.slane %v1229_v33, 2  ;;  %v1224_v38 = vadd.f32 %v1223_v36, %v1222_v15 }
 0x320   : > { %v1248_v41 = vsel %vm341_vm1, %v1204_v35, 0.0  ;;  %v1205_v42 = vmul.f32 %v1197_v37, %v2129_v54  ;;  %v1218_v48 = vrot.slane %v1217_v40, 1  ;;  %v1212_v54 = vadd.f32 %v1211_v55, %v1210_v44 }
 0x321   : > { %v1249_v45 = vrot.slane %v1248_v41, 4  ;;  %v1243_v49 = vadd.f32 %v1242_v39, %v1241_v34  ;;  %v1237_v20 = vrot.slane %v1236_v43, 2  ;;  %v1231_v50 = vadd.f32 %v1230_v19, %v1229_v33 }
 0x322   : > { %v1255_v47 = vsel %vm341_vm1, %v1205_v42, 0.0  ;;  %v1225_v52 = vrot.slane %v1224_v38, 1  ;;  %v1219_v59 = vadd.f32 %v1218_v48, %v1217_v40  ;;  %v1268_v23 = vmul.f32 %v1267_v5, %v1212_v54  ;;  %v1836_v54 = vld [vmem:[%s2096_s9] sm:$0x1f] }
 0x323   : > { %v1256_v51 = vrot.slane %v1255_v47, 4  ;;  %v1250_v53 = vadd.f32 %v1249_v45, %v1248_v41  ;;  %v1244_v60 = vrot.slane %v1243_v49, 2  ;;  %v1238_v61 = vadd.f32 %v1237_v20, %v1236_v43 }
 0x324   : > { %v1232_v63 = vrot.slane %v1231_v50, 1  ;;  %v1226_v6 = vadd.f32 %v1225_v52, %v1224_v38  ;;  %v1269_v7 = vmul.f32 %v1267_v5, %v1219_v59  ;;  %v1263_v33 = vadd.f32 %v2355_v0, %v2289_v29 }
 0x325   : > { %v1257_v3 = vadd.f32 %v1256_v51, %v1255_v47  ;;  %v1251_v57 = vrot.slane %v1250_v53, 2  ;;  %v1245_v28 = vadd.f32 %v1244_v60, %v1243_v49  ;;  %v1239_v46 = vrot.slane %v1238_v61, 1 }
 0x326   : > { %v1233_v10 = vadd.f32 %v1232_v63, %v1231_v50  ;;  %v1270_v12 = vmul.f32 %v1267_v5, %v1226_v6  ;;  %v1284_v58 = vsel %vm466_vm2, %v1269_v7, %v1268_v23  ;;  %v1264_v37 = vmul.f32 0.5, %v1263_v33 }
 0x327   : > { %v1258_v11 = vrot.slane %v1257_v3, 2  ;;  %v1252_v18 = vadd.f32 %v1251_v57, %v1250_v53  ;;  %v1246_v21 = vrot.slane %v1245_v28, 1  ;;  %v1240_v16 = vadd.f32 %v1239_v46, %v1238_v61  ;;  %v1837_v46 = vld [vmem:[%s2096_s9 + $0x8] sm:$0x1f] }
 0x328   : > { %v1271_v17 = vmul.f32 %v1267_v5, %v1233_v10  ;;  %v1285_v27 = vsel %vm468_vm3, %v1270_v12, %v1284_v58  ;;  %v1294_v44 = vstv %s1730_s6 }
 0x329   : > { %v1259_v62 = vadd.f32 %v1258_v11, %v1257_v3  ;;  %v1253_v24 = vrot.slane %v1252_v18, 1  ;;  %v1247_v15 = vadd.f32 %v1246_v21, %v1245_v28  ;;  %v1272_v25 = vmul.f32 %v1267_v5, %v1240_v16 }
 0x32a   : > { %v1286_v14 = vsel %vm470_vm4, %v1271_v17, %v1285_v27  ;;  %v1839_v17 = vld [vmem:[%s2096_s9 + $0x20] sm:$0x1f] }
 0x32b   : > { %v1260_v56 = vrot.slane %v1259_v62, 1  ;;  %v1254_v30 = vadd.f32 %v1253_v24, %v1252_v18  ;;  %v1273_v31 = vmul.f32 %v1267_v5, %v1247_v15  ;;  %v1287_v32 = vsel %vm472_vm5, %v1272_v25, %v1286_v14  ;;  %v1838_v18 = vld [vmem:[%s2096_s9 + $0x18] sm:$0x1f]  ;;  %v1840_v15 = vld [vmem:[%s2096_s9 + $0x28] sm:$0x1f] }
 0x32d   : > { %v1261_v1 = vadd.f32 %v1260_v56, %v1259_v62  ;;  %v1274_v26 = vmul.f32 %v1267_v5, %v1254_v30  ;;  %v1288_v34 = vsel %vm474_vm6, %v1273_v31, %v1287_v32  ;;  %v1841_v30 = vld [vmem:[%s2096_s9 + $0x30] sm:$0x1f] }
 0x32f   : > { %v1275_v35 = vmul.f32 %v1267_v5, %v1261_v1  ;;  %v1289_v39 = vsel %vm476_vm7, %v1274_v26, %v1288_v34  ;;  %v1842_v1 = vld [vmem:[%s2096_s9 + $0x38] sm:$0x1f]  ;;  %s1613_s9 = sshll.u32 %s2240_s16, 4  ;;  %s2497_s9 = int_to_ptr.vmem [resolvable:$true] %s1613_s9 }
 0x330   : > { %s1873_s17 = scalar_lea.vmem %s2497_s9, 640  ;;  %p1880_p8 = scmp.lt.s32.totalorder %s2497_s9, %s1878_s23 }
 0x331   : > { %v1290_v43 = vsel %vm478_vm8, %v1275_v35, %v1289_v39  ;;  %p1874_p10 = scmp.ne.s32.totalorder %s2497_s9, %s1873_s17  ;;  %p1881_p11 = scmp.lt.s32.totalorder %s1879_s25, %s1873_s17 }
 0x333   : > { %p1875_p0 = pnand %p1874_p10, %p2566_p12  ;;  %p1882_p13 = por %p1881_p11, %p1880_p8 }
 0x335   : > { %p1876_p7 = pneg %p1875_p0 }
 0x337   : > { %p1883_p1 = pnand %p1882_p13, %p1876_p7 }
 0x33e   : > { %v2431_v36 = vpop.f32.mrf.mxu0 }
 0x33f   : > { %v1262_v40 = vadd.f32 %v2431_v36, %v2361_v8 }
 0x340   : > { %v1762_v41 = vpop.f32.mrf.mxu0 }
 0x341   : > { %v1265_v42 = vsub.f32 %v1262_v40, %v1264_v37 }
 0x343   : > { %v2437_v19 = vsub.f32 %v1265_v42, %v1290_v43 }
 0x345   : > { %v1297_v29 = vsub.f32 0.0, %v2437_v19  ;;  %v1295_v0 = vsub.f32 %v2437_v19, %v1294_v44 }
 0x347   : > { %v1298_v38 = vsub.f32 %v1297_v29, %v1294_v44  ;;  %v1296_v45 = vmax.f32 %v1295_v0, 0.0 }
 0x349   : > { %v1299_v47 = vmax.f32 %v1298_v38, 0.0 }
 0x34b   : > { %v1300_v48 = vsub.f32 %v1296_v45, %v1299_v47 }
 0x34d   : > { %1731 = vst.msk [vmem:[%s2240_s16 + $0x18] sm:$0xff] %vm481_vm9, %v1300_v48  ;;  %1764 = vmatpush3.msra.mxu1 %v1300_v48  ;;  %v1303_v8 = vsub.f32 %v1300_v48, %v2365_v13 }
 0x34e   : > { %1766 = vmatmul.mubr.msk.f32.vlgmr.msra.gmra.mxu1 %vm483_vm10, %v2229_v22 }
 0x34f   : > { %v1312_v49 = vrot.slane %v1303_v8, %v2287_v4  ;;  %v1305_v20 = vcombine.high %v1303_v8, %v1303_v8 }
 0x351   : > { %v1328_v55 = vrot.slane %v1312_v49, %v2287_v4  ;;  %v1320_v50 = vcombine.high %v1312_v49, %v1312_v49  ;;  %v1319_v51 = vrot.slane %v1305_v20, %v2287_v4 }
 0x353   : > { %v1357_v52 = vrot.slane %v1328_v55, %v2073_v2  ;;  %v1342_v53 = vrot.slane %v1320_v50, %v2287_v4  ;;  %v1350_v59 = vcombine.high %v1328_v55, %v1328_v55  ;;  %v1335_v60 = vrot.slane %v1319_v51, %v2287_v4 }
 0x354   : > { %v1321_v61 = vcombine.high %v1319_v51, %v1319_v51 }
 0x355   : > { %v1394_v22 = vmul.f32 %v1836_v54, %v1357_v52  ;;  %v1361_v63 = vrot.slane %v1342_v53, %v2073_v2  ;;  %v1365_v3 = vrot.slane %v1350_v59, %v2073_v2  ;;  %v1352_v5 = vcombine.high %v1342_v53, %v1342_v53 }
 0x356   : > { %v1373_v6 = vrot.slane %v1335_v60, %v2073_v2  ;;  %v1349_v57 = vrot.slane %v1321_v61, %v2287_v4  ;;  %v1351_v7 = vcombine.high %v1335_v60, %v1335_v60 }
 0x357   : > { %v1402_v28 = vsel %vm341_vm1, %v1394_v22, 0.0  ;;  %v1395_v23 = vmul.f32 %v1837_v46, %v1361_v63  ;;  %v1396_v10 = vmul.f32 %v2410_v9, %v1365_v3  ;;  %v1369_v11 = vrot.slane %v1352_v5, %v2073_v2 }
 0x358   : > { %1403 = vadd.xlane.f32.xlu1 %v1402_v28  ;;  %v1377_v21 = vrot.slane %v1349_v57, %v2073_v2  ;;  %v1353_v16 = vcombine.high %v1349_v57, %v1349_v57  ;;  %v1398_v62 = vmul.f32 %v1839_v17, %v1373_v6  ;;  %v1381_v27 = vrot.slane %v1351_v7, %v2073_v2 }
 0x359   : > { %v1405_v12 = vsel %vm341_vm1, %v1395_v23, 0.0  ;;  %v1397_v58 = vmul.f32 %v1838_v18, %v1369_v11  ;;  %v1408_v4 = vsel %vm341_vm1, %v1396_v10, 0.0 }
 0x35a   : > { %1406 = vadd.xlane.f32.xlu0 %v1405_v12  ;;  %v1399_v25 = vmul.f32 %v1840_v15, %v1377_v21  ;;  %v1385_v14 = vrot.slane %v1353_v16, %v2073_v2  ;;  %v1414_v56 = vsel %vm341_vm1, %v1398_v62, 0.0  ;;  %v1400_v31 = vmul.f32 %v1841_v30, %v1381_v27 }
 0x35b   : > { %v1411_v24 = vsel %vm341_vm1, %v1397_v58, 0.0 }
 0x35c   : > { %1409 = vadd.xlane.f32.xlu1 %v1408_v4  ;;  %v1417_v32 = vsel %vm341_vm1, %v1399_v25, 0.0  ;;  %v1401_v33 = vmul.f32 %v1842_v1, %v1385_v14  ;;  %v1420_v26 = vsel %vm341_vm1, %v1400_v31, 0.0 }
 0x35e   : > { %1412 = vadd.xlane.f32.xlu0 %v1411_v24  ;;  %v1423_v34 = vsel %vm341_vm1, %v1401_v33, 0.0 }
 0x360   : > { %1415 = vadd.xlane.f32.xlu1 %v1414_v56 }
 0x362   : > { %1418 = vadd.xlane.f32.xlu0 %v1417_v32 }
 0x364   : > { %1421 = vadd.xlane.f32.xlu1 %v1420_v26 }
 0x366   : > { %1424 = vadd.xlane.f32.xlu0 %v1423_v34 }
 0x3e1   : > { %v1404_v35 = vpop.xlane.xlu1 %1403 }
 0x3e2   : > { %v1426_v37 = vmul.f32 %v1836_v54, %v1404_v35 }
 0x3e3   : > { %v1407_v2 = vpop.xlane.xlu0 %1406 }
 0x3e4   : > { %v1434_v40 = vsel %vm341_vm1, %v1426_v37, 0.0  ;;  %v1427_v39 = vmul.f32 %v1837_v46, %v1407_v2 }
 0x3e5   : > { %v1435_v41 = vrot.slane %v1434_v40, 4  ;;  %v1410_v42 = vpop.xlane.xlu1 %1409 }
 0x3e6   : > { %v1441_v43 = vsel %vm341_vm1, %v1427_v39, 0.0  ;;  %v1428_v44 = vmul.f32 %v2410_v9, %v1410_v42 }
 0x3e7   : > { %v1442_v29 = vrot.slane %v1441_v43, 4  ;;  %v1413_v0 = vpop.xlane.xlu0 %1412  ;;  %v1436_v47 = vadd.f32 %v1435_v41, %v1434_v40 }
 0x3e8   : > { %v1448_v38 = vsel %vm341_vm1, %v1428_v44, 0.0  ;;  %v1429_v45 = vmul.f32 %v1838_v18, %v1413_v0 }
 0x3e9   : > { %v1443_v48 = vadd.f32 %v1442_v29, %v1441_v43  ;;  %v1449_v8 = vrot.slane %v1448_v38, 4  ;;  %v1416_v49 = vpop.xlane.xlu1 %1415  ;;  %v1437_v9 = vrot.slane %v1436_v47, 2 }
 0x3ea   : > { %v1455_v20 = vsel %vm341_vm1, %v1429_v45, 0.0  ;;  %v1430_v55 = vmul.f32 %v1839_v17, %v1416_v49 }
 0x3eb   : > { %v1450_v50 = vadd.f32 %v1449_v8, %v1448_v38  ;;  %v1456_v51 = vrot.slane %v1455_v20, 4  ;;  %v1419_v52 = vpop.xlane.xlu0 %1418  ;;  %v1444_v53 = vrot.slane %v1443_v48, 2  ;;  %v1438_v10 = vadd.f32 %v1437_v9, %v1436_v47 }
 0x3ec   : > { %v1462_v59 = vsel %vm341_vm1, %v1430_v55, 0.0  ;;  %v1431_v60 = vmul.f32 %v1840_v15, %v1419_v52 }
 0x3ed   : > { %v1422_v61 = vpop.xlane.xlu1 %1421  ;;  %v1457_v54 = vadd.f32 %v1456_v51, %v1455_v20  ;;  %v1463_v22 = vrot.slane %v1462_v59, 4  ;;  %v1451_v5 = vrot.slane %v1450_v50, 2  ;;  %v1445_v57 = vadd.f32 %v1444_v53, %v1443_v48 }
 0x3ee   : > { %v1469_v63 = vsel %vm341_vm1, %v1431_v60, 0.0  ;;  %v1432_v3 = vmul.f32 %v1841_v30, %v1422_v61  ;;  %v1439_v17 = vrot.slane %v1438_v10, 1  ;;  %v1560_v53 = vadd.f32 %v2431_v36, %v2365_v13 }
 0x3ef   : > { %v1425_v6 = vpop.xlane.xlu0 %1424  ;;  %v1470_v7 = vrot.slane %v1469_v63, 4  ;;  %v1464_v23 = vadd.f32 %v1463_v22, %v1462_v59  ;;  %v1458_v11 = vrot.slane %v1457_v54, 2  ;;  %v1452_v12 = vadd.f32 %v1451_v5, %v1450_v50 }
 0x3f0   : > { %v1476_v28 = vsel %vm341_vm1, %v1432_v3, 0.0  ;;  %v1433_v46 = vmul.f32 %v1842_v1, %v1425_v6  ;;  %v1446_v21 = vrot.slane %v1445_v57, 1  ;;  %v1440_v30 = vadd.f32 %v1439_v17, %v1438_v10 }
 0x3f1   : > { %v1477_v18 = vrot.slane %v1476_v28, 4  ;;  %v1471_v16 = vadd.f32 %v1470_v7, %v1469_v63  ;;  %v1465_v4 = vrot.slane %v1464_v23, 2  ;;  %v1459_v62 = vadd.f32 %v1458_v11, %v1457_v54 }
 0x3f2   : > { %v1483_v58 = vsel %vm341_vm1, %v1433_v46, 0.0  ;;  %v1453_v24 = vrot.slane %v1452_v12, 1  ;;  %v1447_v25 = vadd.f32 %v1446_v21, %v1445_v57  ;;  %v1564_v1 = vstv %s1733_s7 }
 0x3f3   : > { %v1484_v27 = vrot.slane %v1483_v58, 4  ;;  %v1478_v15 = vadd.f32 %v1477_v18, %v1476_v28  ;;  %v1472_v14 = vrot.slane %v1471_v16, 2  ;;  %v1466_v56 = vadd.f32 %v1465_v4, %v1464_v23 }
 0x3f4   : > { %v1460_v31 = vrot.slane %v1459_v62, 1  ;;  %v1454_v33 = vadd.f32 %v1453_v24, %v1452_v12  ;;  %v1566_v34 = vmul.f32 %v1564_v1, %v1447_v25  ;;  %v1565_v2 = vmul.f32 %v1564_v1, %v1440_v30 }
 0x3f5   : > { %v1485_v32 = vadd.f32 %v1484_v27, %v1483_v58  ;;  %v1479_v26 = vrot.slane %v1478_v15, 2  ;;  %v1473_v35 = vadd.f32 %v1472_v14, %v1471_v16  ;;  %v1467_v37 = vrot.slane %v1466_v56, 1 }
 0x3f6   : > { %v1461_v40 = vadd.f32 %v1460_v31, %v1459_v62  ;;  %v1567_v41 = vmul.f32 %v1564_v1, %v1454_v33  ;;  %v1581_v43 = vsel %vm466_vm2, %v1566_v34, %v1565_v2  ;;  %v1561_v54 = vmul.f32 0.5, %v1560_v53 }
 0x3f7   : > { %v1486_v39 = vrot.slane %v1485_v32, 2  ;;  %v1480_v42 = vadd.f32 %v1479_v26, %v1478_v15  ;;  %v1474_v44 = vrot.slane %v1473_v35, 1  ;;  %v1468_v29 = vadd.f32 %v1467_v37, %v1466_v56 }
 0x3f8   : > { %v1568_v0 = vmul.f32 %v1564_v1, %v1461_v40  ;;  %v1582_v45 = vsel %vm468_vm3, %v1567_v41, %v1581_v43  ;;  %v1591_v57 = vstv %s1734_s8 }
 0x3f9   : > { %v1487_v38 = vadd.f32 %v1486_v39, %v1485_v32  ;;  %v1481_v47 = vrot.slane %v1480_v42, 1  ;;  %v1475_v48 = vadd.f32 %v1474_v44, %v1473_v35  ;;  %v1569_v8 = vmul.f32 %v1564_v1, %v1468_v29 }
 0x3fa   : > { %v1583_v49 = vsel %vm470_vm4, %v1568_v0, %v1582_v45 }
 0x3fb   : > { %v1488_v20 = vrot.slane %v1487_v38, 1  ;;  %v1482_v55 = vadd.f32 %v1481_v47, %v1480_v42  ;;  %v1570_v50 = vmul.f32 %v1564_v1, %v1475_v48  ;;  %v1584_v51 = vsel %vm472_vm5, %v1569_v8, %v1583_v49 }
 0x3fd   : > { %v1489_v52 = vadd.f32 %v1488_v20, %v1487_v38  ;;  %v1571_v59 = vmul.f32 %v1564_v1, %v1482_v55  ;;  %v1585_v60 = vsel %vm474_vm6, %v1570_v50, %v1584_v51 }
 0x3ff   : > { %v1572_v9 = vmul.f32 %v1564_v1, %v1489_v52  ;;  %v1586_v63 = vsel %vm476_vm7, %v1571_v59, %v1585_v60 }
 0x401   : > { %v1587_v6 = vsel %vm478_vm8, %v1572_v9, %v1586_v63 }
 0x40e   : > { %v1556_v61 = vpop.f32.mrf.mxu1 }
 0x40f   : > { %v1557_v22 = vadd.f32 %v1556_v61, %v2437_v19 }
 0x410   : > { %v1767_v3 = vpop.f32.mrf.mxu1 }
 0x411   : > { %v1562_v5 = vsub.f32 %v1557_v22, %v1561_v54 }
 0x413   : > { %v1589_v13 = vsub.f32 %v1562_v5, %v1587_v6 }
 0x415   : > { %v1592_v36 = vsub.f32 %v1589_v13, %v1591_v57  ;;  %v1594_v7 = vsub.f32 0.0, %v1589_v13 }
 0x417   : > { %v1595_v28 = vsub.f32 %v1594_v7, %v1591_v57  ;;  %v1593_v19 = vmax.f32 %v1592_v36, 0.0 }
 0x419   : > { %v1596_v46 = vmax.f32 %v1595_v28, 0.0 }
 0x41b   : > { %v1597_v23 = vsub.f32 %v1593_v19, %v1596_v46 }
 0x41d   : > { %1735 = vst.msk [vmem:[%s2240_s16 + $0x20] sm:$0xff] %vm481_vm9, %v1597_v23 }
 0x41e   : > { %1886 = shalt.err (!%p1883_p1)
}
 0x41f   : > { %s1887_s12 = scalar_lea.hbm %s2502_s14, 640  ;;  %s1891_s30 = scalar_lea.hbm %s2553_s5, 1280 }
 0x420   : > { %p1888_p2 = scmp.ne.s32.totalorder %s2502_s14, %s1887_s12  ;;  %p1892_p9 = scmp.lt.s32.totalorder %s2502_s14, %s2553_s5 }
 0x421   : > { %p1893_p5 = scmp.lt.s32.totalorder %s1891_s30, %s1887_s12 }
 0x422   : > { %p1889_p3 = pnand %p1888_p2, %p2566_p12 }
 0x423   : > { %p1894_p6 = por %p1893_p5, %p1892_p9 }
 0x424   : > { %p1890_p4 = pneg %p1889_p3 }
 0x426   : > { %p1895_p10 = pnand %p1894_p6, %p1890_p4 }
 0x428   : > { %1898 = shalt.err (!%p1895_p10)
}
 0x429   : > { %s1949_s8 = smov 128   ;;  %s1950_s10 = smov 256  }
 0x42a   : > { %s1951_s11 = smov 8  }
 0x42b   : > { %1777 = dma.vmem_to_hbm [thread:$0]  (%p2566_p12), %s2497_s9, 640, %s2502_s14, %s2508_s15, %s1949_s8, %s1950_s10, %s1951_s11  }
 0x42c PF: > { %p1794_p0 = scmp.ge.s32.totalorder %s1941_s21, 2  ;;  %s1628_s13 = sand.u32 1, %s1929_s18  }
 0x42d   : > { %p2567_p7 = scmp.ne.s32.totalorder %s2558_s29, 0  ;;  %s1629_s17 = scalar_lea.sflag [#allocation3], %s1628_s13 }
 0x42f   : > { %p1787_p8 = pnand %p1794_p0, %p2567_p7 }
 0x431   : > { %p1788_p11 = pneg %p1787_p8 }
 0x433   : > { %1924 = dma.done.wait (%p1788_p11), %s1629_s17, 640  }
 0x434   : > { %1926 = vsyncadd (%p1788_p11), %s1629_s17, 4294966656  ;;  %p17_p13 = scmp.ge.s32.totalorder %s2007_s24, 4   ;;  %s2568_s18 = smov %s1933_s19 }
 0x435   : > { %s2569_s19 = smov %s1937_s20  ;;  %s2570_s20 = smov %s2018_s27 }
 0x436   : > { %s2571_s21 = smov %s2007_s24  ;;  %19 = sbr.rel (!%p17_p13) target bundleno = 5 (0x5), region = 91 }
 0x43b   :  { %1634 = vsyncpa [#allocation3], 1 }
 0x43c   :  { %1636 = vsyncpa [#allocation3 + $0x1], 1 }
 0x43d   :  { %1637 = vsyncpa [#allocation4], 1 }
 0x43e   :  { %1639 = vsyncpa [#allocation4 + $0x1], 1 }
 0x43f   :  { %1640 = vsyncpa [#allocation6], 1 }

</bundles_post_ra>
